<compile_context>
chip_gen: v7x
topology: tpu7x:2x2x1
jax: 0.10.0
libtpu: 0.0.40
codegen_flags: <defaults>
</compile_context>

<pallas_src>
import functools

import jax
import jax.numpy as jnp
from jax.experimental import pallas as pl
from jax.experimental.pallas import tpu as pltpu

_LANE = 128
_SUBLANE = 8


def _round_up(n, m):
    return (n + m - 1) // m * m


def _lstm_fused_kernel(x_ref, wih_ref, whh_ref, b_ref, wlin_ref, blin_ref,
                       out_ref, xg_ref, h_ref, c_ref,
                       *, seq_len, time_chunk, ragged):
    """Grid = (batch_block, time_chunk). One step = Tc timesteps of one batch block.

    x_ref    : (Tc*Bb, I)    bf16  time-major rows of this chunk / batch block
    wih_ref  : (I, 4*Hp)     bf16  W_ih^T (gate blocks lane-aligned, g-gate x2)
    whh_ref  : (Hp, 4*Hp)    bf16  W_hh^T (g-gate columns x2)
    b_ref    : (1, 4*Hp)     f32   b_ih + b_hh (g-gate block x2)
    wlin_ref : (Hp, Op)      bf16  W_lin^T
    blin_ref : (1, Op)       f32
    out_ref  : (Bb, Op)      f32   written once, at the last chunk
    xg_ref   : (Tc*Bb, 4*Hp) f32   scratch: this chunk's input projections
    h_ref/c_ref : (Bb, Hp)   f32   recurrent state, persists across chunks
    """
    chunk = pl.program_id(1)

    @pl.when(chunk == 0)
    def _():
        h_ref[...] = jnp.zeros_like(h_ref)
        c_ref[...] = jnp.zeros_like(c_ref)

    b_blk, h_pad = h_ref.shape

    # (1) Hoisted input projection: ONE MXU matmul covering all Tc timesteps of
    #     this chunk; bias added here once (no broadcast inside the loop).
    xg_ref[...] = (
        jnp.dot(x_ref[...], wih_ref[...], preferred_element_type=jnp.float32)
        + b_ref[...])

    whh = whh_ref[...]  # (Hp, 4Hp) bf16, loop-invariant hoist
    # TODO(synk): pltpu.matmul_push_rhs / matmul_acc_lhs could keep W_hh resident
    # in the MXU weight registers across the chunk (perf-review suggestion); not
    # used because a (Hp, 4Hp) RHS spans multiple weight-staging pushes and the
    # explicit-MXU path is fragile to lower -- jnp.dot kept for robustness.

    # (2) Serial recurrence over the chunk (partial unroll; steps are serially
    #     dependent so full unroll adds no ILP). State + gate math stay f32;
    #     only MXU operands are bf16.
    def step(t, carry):
        h, c = carry                                      # f32 (Bb, Hp)
        row0 = pl.multiple_of(t * b_blk, _SUBLANE)
        pre = xg_ref[pl.ds(row0, b_blk), :]               # (Bb, 4Hp) f32
        gates = pre + jnp.dot(h.astype(whh.dtype), whh,
                              preferred_element_type=jnp.float32)
        # One wide EUP pass over all 4 gate blocks. The g-gate pre-activation was
        # scaled by 2 at pack time, so tanh(a_g) == 2*sigmoid(2*a_g) - 1 exactly.
        s = jax.nn.sigmoid(gates)                         # (Bb, 4Hp)
        i_g = s[:, 0 * h_pad:1 * h_pad]
        f_g = s[:, 1 * h_pad:2 * h_pad]
        g_g = 2.0 * s[:, 2 * h_pad:3 * h_pad] - 1.0       # tanh(a_g)
        o_g = s[:, 3 * h_pad:4 * h_pad]
        c_new = f_g * c + i_g * g_g
        h_new = o_g * (2.0 * jax.nn.sigmoid(2.0 * c_new) - 1.0)  # tanh(c_new)
        if ragged:
            # Masked ragged tail: padded timesteps must NOT update the state
            # (bias + recurrence would still evolve h/c even for zero input).
            valid = (chunk * time_chunk + t) < seq_len
            h_new = jnp.where(valid, h_new, h)
            c_new = jnp.where(valid, c_new, c)
        return h_new, c_new

    h_new, c_new = jax.lax.fori_loop(
        0, time_chunk, step, (h_ref[...], c_ref[...]),
        unroll=min(8, time_chunk))
    h_ref[...] = h_new
    c_ref[...] = c_new

    # (3) Final Linear on the last hidden state; lane-dense (Bb, Op) store.
    #     Dropout at inference is identity.
    #     TODO(synk): training-mode dropout (Bernoulli mask via pltpu.prng_*) not implemented.
    @pl.when(chunk == pl.num_programs(1) - 1)
    def _():
        y = (jnp.dot(h_new.astype(wlin_ref.dtype), wlin_ref[...],
                     preferred_element_type=jnp.float32)
             + blin_ref[...])
        out_ref[...] = y.astype(out_ref.dtype)


def lstm_model_forward(x, packed, *, time_chunk=64, batch_block=None,
                       single_buffer_weights=None):
    """x: (B, S, I) batch_first float32 (like PyTorch). Returns (B, output_size) f32.

    time_chunk    : timesteps per grid step (default 64; amortizes grid overhead).
    batch_block   : rows per batch grid block. Default None = one block. On v7x
                    with B >= 16 set e.g. ceil(B/2) rounded to 8 to use both TCs.
    single_buffer_weights : pl.Buffered(1) on the resident weights. Default: auto
                    (enabled only when weights are large; matters on v7x 64 MiB).
    """
    B, S, I = x.shape
    assert I == packed["I"]
    H, Hp, O, Op = packed["H"], packed["Hp"], packed["O"], packed["Op"]
    G = 4 * Hp

    # Batch padding / blocking.
    Bp = _round_up(max(B, _SUBLANE), _SUBLANE)
    if batch_block is None:
        Bb = Bp
    else:
        Bb = _round_up(min(batch_block, Bp), _SUBLANE)
        Bp = _round_up(Bp, Bb)
    n_bblocks = Bp // Bb

    # Time chunking (ragged tail handled by in-kernel masking, not divisor search).
    Tc = max(1, min(time_chunk, S))
    n_chunks = pl.cdiv(S, Tc)
    Sp = n_chunks * Tc
    ragged = (Sp != S)
    rows_per_chunk = Tc * Bb

    # Layout: cast to bf16 FIRST, then time-major, pad batch -> Bp and time -> Sp,
    # group batch into blocks of Bb, flatten (time, batch-in-block) rows.
    # Input feature dim I is kept un-padded (block last dim == array dim is legal).
    xd = packed["wih"].dtype
    x_tm = jnp.transpose(x.astype(xd), (1, 0, 2))                    # (S, B, I)
    x_tm = jnp.zeros((Sp, Bp, I), xd).at[:S, :B, :].set(x_tm)
    x3 = (x_tm.reshape(Sp, n_bblocks, Bb, I)
              .transpose(1, 0, 2, 3)
              .reshape(n_bblocks, Sp * Bb, I))                       # (nb, Sp*Bb, I)

    # Weight residency: constant index maps -> DMA'd once. Auto single-buffer
    # when the weights are large (halves resident footprint on v7x's 64 MiB).
    weight_bytes = (packed["wih"].size * 2 + packed["whh"].size * 2
                    + packed["wlin"].size * 2 + (G + Op) * 4)
    if single_buffer_weights is None:
        single_buffer_weights = weight_bytes > (8 << 20)

    def w_spec(shape):
        idx = lambda b, c: (0,) * len(shape)
        if single_buffer_weights:
            return pl.BlockSpec(shape, idx, pipeline_mode=pl.Buffered(1))
        return pl.BlockSpec(shape, idx)

    grid_spec = pltpu.PrefetchScalarGridSpec(
        num_scalar_prefetch=0,
        grid=(n_bblocks, n_chunks),
        in_specs=[
            # x chunk for (batch block b, time chunk c); leading dim squeezed.
            pl.BlockSpec((None, rows_per_chunk, I), lambda b, c: (b, c, 0)),
            w_spec((I, G)),
            w_spec((Hp, G)),
            w_spec((1, G)),
            w_spec((Hp, Op)),
            w_spec((1, Op)),
        ],
        out_specs=pl.BlockSpec((Bb, Op), lambda b, c: (b, 0)),
        scratch_shapes=[
            pltpu.VMEM((rows_per_chunk, G), jnp.float32),  # per-chunk input proj
            pltpu.VMEM((Bb, Hp), jnp.float32),             # h state
            pltpu.VMEM((Bb, Hp), jnp.float32),             # c state
        ],
    )

    # Per-generation VMEM budget from actual buffer arithmetic (x is double
    # buffered, weights 1x/2x, plus scratch, state and output), capped below the
    # queried physical VMEM (64 MiB on v7x, 128 MiB on v5e/v6e).
    need = (2 * rows_per_chunk * I * 2
            + (1 if single_buffer_weights else 2) * weight_bytes
            + rows_per_chunk * G * 4
            + 2 * Bb * Hp * 4
            + 2 * Bb * Op * 4)
    try:
        vmem_cap = pltpu.get_tpu_info().vmem_capacity_bytes
    except Exception:
        vmem_cap = 64 * 1024 * 1024
    vmem_limit = min(int(vmem_cap * 0.85), max(2 * need, 32 * 1024 * 1024))

    kernel = functools.partial(
        _lstm_fused_kernel, seq_len=S, time_chunk=Tc, ragged=ragged)

    out = pl.pallas_call(
        kernel,
        out_shape=jax.ShapeDtypeStruct((Bp, Op), jnp.float32),
        grid_spec=grid_spec,
        compiler_params=pltpu.CompilerParams(
            # Batch blocks are independent (megacore on v7x); time is serial.
            dimension_semantics=("parallel", "arbitrary"),
            vmem_limit_bytes=vmem_limit,
        ),
    )(x3, packed["wih"], packed["whh"], packed["b"],
      packed["wlin"], packed["blin"])

    return out[:B, :O]


def init_params(key, input_size, hidden_size, output_size):
    """Raw parameters matching torch's nn.LSTM / nn.Linear layouts."""
    k = jax.random.split(key, 6)
    s = 1.0 / jnp.sqrt(hidden_size)
    return {
        "w_ih": jax.random.uniform(k[0], (4 * hidden_size, input_size), jnp.float32, -s, s),
        "w_hh": jax.random.uniform(k[1], (4 * hidden_size, hidden_size), jnp.float32, -s, s),
        "b_ih": jax.random.uniform(k[2], (4 * hidden_size,), jnp.float32, -s, s),
        "b_hh": jax.random.uniform(k[3], (4 * hidden_size,), jnp.float32, -s, s),
        "w_lin": jax.random.uniform(k[4], (output_size, hidden_size), jnp.float32, -s, s),
        "b_lin": jax.random.uniform(k[5], (output_size,), jnp.float32, -s, s),
    }


def pack_params(raw, mxu_dtype=jnp.bfloat16):
    """Transpose, lane-align the per-gate blocks (Hp = 128-multiple), fold the two
    biases, pre-scale the g-gate pre-activation by 2 (single-sigmoid tanh trick),
    and cast all matmul weights to the MXU dtype. Zero padding is exact (padded
    hidden units stay at h = c = 0)."""
    w_ih, w_hh = raw["w_ih"], raw["w_hh"]        # (4H, I), (4H, H)
    b = raw["b_ih"] + raw["b_hh"]                # (4H,)
    w_lin, b_lin = raw["w_lin"], raw["b_lin"]    # (O, H), (O,)
    H = w_hh.shape[1]
    I = w_ih.shape[1]
    O = w_lin.shape[0]
    Hp = _round_up(H, _LANE)
    Op = _round_up(O, _LANE)
    G = 4 * Hp

    # Gate order (i, f, g, o). Scaling the g-gate by 2 is exact in bf16
    # (power-of-two) and lets the kernel use tanh(x) = 2*sigmoid(2x) - 1.
    gate_scale = (1.0, 1.0, 2.0, 1.0)

    def pad_gate_cols(w_t, rows, rows_pad):
        out = jnp.zeros((rows_pad, G), jnp.float32)
        for g in range(4):
            out = out.at[:rows, g * Hp:g * Hp + H].set(
                gate_scale[g] * w_t[:, g * H:(g + 1) * H])
        return out

    b_p = jnp.zeros((1, G), jnp.float32)
    for g in range(4):
        b_p = b_p.at[0, g * Hp:g * Hp + H].set(gate_scale[g] * b[g * H:(g + 1) * H])

    return {
        "wih": pad_gate_cols(w_ih.T, I, I).astype(mxu_dtype),    # (I, 4Hp)  (I NOT padded)
        "whh": pad_gate_cols(w_hh.T, H, Hp).astype(mxu_dtype),   # (Hp, 4Hp)
        "b": b_p,                                                # (1, 4Hp) f32
        "wlin": jnp.zeros((Hp, Op), jnp.float32).at[:H, :O].set(w_lin.T).astype(mxu_dtype),
        "blin": jnp.zeros((1, Op), jnp.float32).at[0, :O].set(b_lin),
        "H": H, "Hp": Hp, "I": I, "O": O, "Op": Op,
    }


def _lstm_reference(x, raw):
    """Pure-JAX f32 reference of LSTMModel.forward (eval mode)."""
    w_ih, w_hh = raw["w_ih"], raw["w_hh"]
    b = raw["b_ih"] + raw["b_hh"]
    H = w_hh.shape[1]
    B, S, _ = x.shape
    h = jnp.zeros((B, H), jnp.float32)
    c = jnp.zeros((B, H), jnp.float32)
    for t in range(S):
        g = x[:, t, :] @ w_ih.T + h @ w_hh.T + b
        i_g = jax.nn.sigmoid(g[:, 0 * H:1 * H])
        f_g = jax.nn.sigmoid(g[:, 1 * H:2 * H])
        g_g = jnp.tanh(g[:, 2 * H:3 * H])
        o_g = jax.nn.sigmoid(g[:, 3 * H:4 * H])
        c = f_g * c + i_g * g_g
        h = o_g * jnp.tanh(c)
    return h @ raw["w_lin"].T + raw["b_lin"]


if __name__ == "__main__":
    # Small shapes consistent with LSTMModel(input_size, hidden_size, output_size).
    # S=10 with time_chunk=4 exercises the multi-chunk grid AND the masked ragged
    # last chunk (3 chunks, last one with 2 valid timesteps).
    B, S, I, H, O = 2, 10, 4, 32, 1

    key = jax.random.PRNGKey(0)
    kx, kp = jax.random.split(key)
    x = jax.random.normal(kx, (B, S, I), dtype=jnp.float32)

    raw = init_params(kp, I, H, O)
    packed = pack_params(raw)

    out = lstm_model_forward(x, packed, time_chunk=4)
    out = jax.block_until_ready(out)
    assert out.shape == (B, O)

    # bf16 MXU operands with f32 accumulation/state -> small numeric drift only.
    ref = _lstm_reference(x, raw)
    max_err = float(jnp.max(jnp.abs(out - ref)))
    assert max_err < 1e-1, f"kernel/reference mismatch: {max_err}"

    print("KERNEL_OK")
</pallas_src>

<mosaic_0001>
module attributes {stable_mosaic.version = 11 : i64} {
  func.func @_lstm_fused_kernel(%arg0: i32, %arg1: i32, %arg2: memref<1x32x4xbf16, #tpu.memory_space<vmem>>, %arg3: memref<4x512xbf16, #tpu.memory_space<vmem>>, %arg4: memref<128x512xbf16, #tpu.memory_space<vmem>>, %arg5: memref<1x512xf32, #tpu.memory_space<vmem>>, %arg6: memref<128x128xbf16, #tpu.memory_space<vmem>>, %arg7: memref<1x128xf32, #tpu.memory_space<vmem>>, %arg8: memref<8x128xf32, #tpu.memory_space<vmem>>, %arg9: memref<32x512xf32, #tpu.memory_space<vmem>>, %arg10: memref<8x128xf32, #tpu.memory_space<vmem>>, %arg11: memref<8x128xf32, #tpu.memory_space<vmem>>) attributes {dimension_semantics = [#tpu.dimension_semantics<parallel>, #tpu.dimension_semantics<arbitrary>], iteration_bounds = array<i64: 1, 3>, scalar_prefetch = 0 : i64, scratch_operands = 3 : i64, tpu.core_type = #tpu.core_type<tc>, window_params = [{transform_indices = @transform_0, window_bounds = array<i64: 1, 32, 4>}, {pipeline_mode = #tpu.pipeline_mode<synchronous>, transform_indices = @transform_1, window_bounds = array<i64: 4, 512>}, {pipeline_mode = #tpu.pipeline_mode<synchronous>, transform_indices = @transform_2, window_bounds = array<i64: 128, 512>}, {pipeline_mode = #tpu.pipeline_mode<synchronous>, transform_indices = @transform_3, window_bounds = array<i64: 1, 512>}, {pipeline_mode = #tpu.pipeline_mode<synchronous>, transform_indices = @transform_4, window_bounds = array<i64: 128, 128>}, {pipeline_mode = #tpu.pipeline_mode<synchronous>, transform_indices = @transform_5, window_bounds = array<i64: 1, 128>}, {transform_indices = @transform_6, window_bounds = array<i64: 8, 128>}]} {
    %c0_i32 = arith.constant 0 : i32
    %0 = arith.cmpi eq, %arg1, %c0_i32 : i32
    %1 = arith.extui %0 : i1 to i32
    %c0_i32_0 = arith.constant 0 : i32
    %2 = arith.cmpi ne, %1, %c0_i32_0 : i32
    scf.if %2 {
      %cst_68 = arith.constant 0.000000e+00 : f32
      %179 = vector.broadcast %cst_68 : f32 to vector<8x128xf32>
      %c0_69 = arith.constant 0 : index
      %c0_70 = arith.constant 0 : index
      %180 = vector.load %arg10[%c0_69, %c0_70] : memref<8x128xf32, #tpu.memory_space<vmem>>, vector<8x128xf32>
      tpu.vector_store %arg10[%c0_69, %c0_70], %179 {strides = array<i32>} : memref<8x128xf32, #tpu.memory_space<vmem>>, vector<8x128xf32>,
      %cst_71 = arith.constant 0.000000e+00 : f32
      %181 = vector.broadcast %cst_71 : f32 to vector<8x128xf32>
      %c0_72 = arith.constant 0 : index
      %c0_73 = arith.constant 0 : index
      %182 = vector.load %arg11[%c0_72, %c0_73] : memref<8x128xf32, #tpu.memory_space<vmem>>, vector<8x128xf32>
      tpu.vector_store %arg11[%c0_72, %c0_73], %181 {strides = array<i32>} : memref<8x128xf32, #tpu.memory_space<vmem>>, vector<8x128xf32>,
    } else {
    }
    %c0 = arith.constant 0 : index
    %c0_1 = arith.constant 0 : index
    %c0_2 = arith.constant 0 : index
    %3 = vector.load %arg2[%c0, %c0_1, %c0_2] : memref<1x32x4xbf16, #tpu.memory_space<vmem>>, vector<1x32x4xbf16>
    %4 = vector.shape_cast %3 : vector<1x32x4xbf16> to vector<32x4xbf16>
    %c0_3 = arith.constant 0 : index
    %c0_4 = arith.constant 0 : index
    %5 = vector.load %arg3[%c0_3, %c0_4] : memref<4x512xbf16, #tpu.memory_space<vmem>>, vector<4x512xbf16>
    %cst = arith.constant dense<0.000000e+00> : vector<32x512xf32>
    %6 = tpu.matmul %4, %5, %cst {dimension_numbers = #tpu.dot_dimension_numbers<[1], [0], [0], [1], [0, 0, 1, 1], [], []>} : vector<32x4xbf16>, vector<4x512xbf16>, vector<32x512xf32> -> vector<32x512xf32>
    %c0_5 = arith.constant 0 : index
    %c0_6 = arith.constant 0 : index
    %7 = vector.load %arg5[%c0_5, %c0_6] : memref<1x512xf32, #tpu.memory_space<vmem>>, vector<1x512xf32>
    %8 = vector.broadcast %7 : vector<1x512xf32> to vector<32x512xf32>
    %9 = arith.addf %6, %8 : vector<32x512xf32>
    %c0_7 = arith.constant 0 : index
    %c0_8 = arith.constant 0 : index
    %10 = vector.load %arg9[%c0_7, %c0_8] : memref<32x512xf32, #tpu.memory_space<vmem>>, vector<32x512xf32>
    tpu.vector_store %arg9[%c0_7, %c0_8], %9 {strides = array<i32>} : memref<32x512xf32, #tpu.memory_space<vmem>>, vector<32x512xf32>,
    %c0_9 = arith.constant 0 : index
    %c0_10 = arith.constant 0 : index
    %11 = vector.load %arg4[%c0_9, %c0_10] : memref<128x512xbf16, #tpu.memory_space<vmem>>, vector<128x512xbf16>
    %c0_11 = arith.constant 0 : index
    %c0_12 = arith.constant 0 : index
    %12 = vector.load %arg10[%c0_11, %c0_12] : memref<8x128xf32, #tpu.memory_space<vmem>>, vector<8x128xf32>
    %c0_13 = arith.constant 0 : index
    %c0_14 = arith.constant 0 : index
    %13 = vector.load %arg11[%c0_13, %c0_14] : memref<8x128xf32, #tpu.memory_space<vmem>>, vector<8x128xf32>
    %c0_i32_15 = arith.constant 0 : i32
    %c8_i32 = arith.constant 8 : i32
    %14 = arith.muli %c0_i32_15, %c8_i32 : i32
    %15 = tpu.assume_multiple %14, 8 : i32
    %16 = arith.index_cast %15 : i32 to index
    %c0_16 = arith.constant 0 : index
    %17 = vector.load %arg9[%16, %c0_16] : memref<32x512xf32, #tpu.memory_space<vmem>>, vector<8x512xf32>
    %18 = arith.truncf %12 : vector<8x128xf32> to vector<8x128xbf16>
    %cst_17 = arith.constant dense<0.000000e+00> : vector<8x512xf32>
    %19 = tpu.matmul %18, %11, %cst_17 {dimension_numbers = #tpu.dot_dimension_numbers<[1], [0], [0], [1], [0, 0, 1, 1], [], []>} : vector<8x128xbf16>, vector<128x512xbf16>, vector<8x512xf32> -> vector<8x512xf32>
    %20 = arith.addf %17, %19 : vector<8x512xf32>
    %21 = arith.negf %20 : vector<8x512xf32>
    %22 = math.exp %21 : vector<8x512xf32>
    %cst_18 = arith.constant 1.000000e+00 : f32
    %23 = vector.broadcast %cst_18 : f32 to vector<8x512xf32>
    %24 = arith.addf %23, %22 : vector<8x512xf32>
    %25 = arith.divf %23, %24 : vector<8x512xf32>
    %26 = vector.extract_strided_slice %25 {offsets = [0, 0], sizes = [8, 128], strides = [1, 1]} : vector<8x512xf32> to vector<8x128xf32>
    %27 = vector.extract_strided_slice %25 {offsets = [0, 128], sizes = [8, 128], strides = [1, 1]} : vector<8x512xf32> to vector<8x128xf32>
    %28 = vector.extract_strided_slice %25 {offsets = [0, 256], sizes = [8, 128], strides = [1, 1]} : vector<8x512xf32> to vector<8x128xf32>
    %cst_19 = arith.constant 2.000000e+00 : f32
    %29 = vector.broadcast %cst_19 : f32 to vector<8x128xf32>
    %30 = arith.mulf %29, %28 : vector<8x128xf32>
    %cst_20 = arith.constant 1.000000e+00 : f32
    %31 = vector.broadcast %cst_20 : f32 to vector<8x128xf32>
    %32 = arith.subf %30, %31 : vector<8x128xf32>
    %33 = vector.extract_strided_slice %25 {offsets = [0, 384], sizes = [8, 128], strides = [1, 1]} : vector<8x512xf32> to vector<8x128xf32>
    %34 = arith.mulf %27, %13 : vector<8x128xf32>
    %35 = arith.mulf %26, %32 : vector<8x128xf32>
    %36 = arith.addf %34, %35 : vector<8x128xf32>
    %cst_21 = arith.constant 2.000000e+00 : f32
    %37 = vector.broadcast %cst_21 : f32 to vector<8x128xf32>
    %38 = arith.mulf %37, %36 : vector<8x128xf32>
    %39 = arith.negf %38 : vector<8x128xf32>
    %40 = math.exp %39 : vector<8x128xf32>
    %cst_22 = arith.constant 1.000000e+00 : f32
    %41 = vector.broadcast %cst_22 : f32 to vector<8x128xf32>
    %42 = arith.addf %41, %40 : vector<8x128xf32>
    %43 = arith.divf %41, %42 : vector<8x128xf32>
    %cst_23 = arith.constant 2.000000e+00 : f32
    %44 = vector.broadcast %cst_23 : f32 to vector<8x128xf32>
    %45 = arith.mulf %44, %43 : vector<8x128xf32>
    %cst_24 = arith.constant 1.000000e+00 : f32
    %46 = vector.broadcast %cst_24 : f32 to vector<8x128xf32>
    %47 = arith.subf %45, %46 : vector<8x128xf32>
    %48 = arith.mulf %33, %47 : vector<8x128xf32>
    %c4_i32 = arith.constant 4 : i32
    %49 = arith.muli %arg1, %c4_i32 : i32
    %50 = arith.addi %49, %c0_i32_15 : i32
    %c10_i32 = arith.constant 10 : i32
    %51 = arith.cmpi slt, %50, %c10_i32 : i32
    %52 = arith.select %51, %48, %12 : vector<8x128xf32>
    %53 = arith.select %51, %36, %13 : vector<8x128xf32>
    %c1_i32 = arith.constant 1 : i32
    %c8_i32_25 = arith.constant 8 : i32
    %54 = arith.muli %c1_i32, %c8_i32_25 : i32
    %55 = tpu.assume_multiple %54, 8 : i32
    %56 = arith.index_cast %55 : i32 to index
    %c0_26 = arith.constant 0 : index
    %57 = vector.load %arg9[%56, %c0_26] : memref<32x512xf32, #tpu.memory_space<vmem>>, vector<8x512xf32>
    %58 = arith.truncf %52 : vector<8x128xf32> to vector<8x128xbf16>
    %cst_27 = arith.constant dense<0.000000e+00> : vector<8x512xf32>
    %59 = tpu.matmul %58, %11, %cst_27 {dimension_numbers = #tpu.dot_dimension_numbers<[1], [0], [0], [1], [0, 0, 1, 1], [], []>} : vector<8x128xbf16>, vector<128x512xbf16>, vector<8x512xf32> -> vector<8x512xf32>
    %60 = arith.addf %57, %59 : vector<8x512xf32>
    %61 = arith.negf %60 : vector<8x512xf32>
    %62 = math.exp %61 : vector<8x512xf32>
    %cst_28 = arith.constant 1.000000e+00 : f32
    %63 = vector.broadcast %cst_28 : f32 to vector<8x512xf32>
    %64 = arith.addf %63, %62 : vector<8x512xf32>
    %65 = arith.divf %63, %64 : vector<8x512xf32>
    %66 = vector.extract_strided_slice %65 {offsets = [0, 0], sizes = [8, 128], strides = [1, 1]} : vector<8x512xf32> to vector<8x128xf32>
    %67 = vector.extract_strided_slice %65 {offsets = [0, 128], sizes = [8, 128], strides = [1, 1]} : vector<8x512xf32> to vector<8x128xf32>
    %68 = vector.extract_strided_slice %65 {offsets = [0, 256], sizes = [8, 128], strides = [1, 1]} : vector<8x512xf32> to vector<8x128xf32>
    %cst_29 = arith.constant 2.000000e+00 : f32
    %69 = vector.broadcast %cst_29 : f32 to vector<8x128xf32>
    %70 = arith.mulf %69, %68 : vector<8x128xf32>
    %cst_30 = arith.constant 1.000000e+00 : f32
    %71 = vector.broadcast %cst_30 : f32 to vector<8x128xf32>
    %72 = arith.subf %70, %71 : vector<8x128xf32>
    %73 = vector.extract_strided_slice %65 {offsets = [0, 384], sizes = [8, 128], strides = [1, 1]} : vector<8x512xf32> to vector<8x128xf32>
    %74 = arith.mulf %67, %53 : vector<8x128xf32>
    %75 = arith.mulf %66, %72 : vector<8x128xf32>
    %76 = arith.addf %74, %75 : vector<8x128xf32>
    %cst_31 = arith.constant 2.000000e+00 : f32
    %77 = vector.broadcast %cst_31 : f32 to vector<8x128xf32>
    %78 = arith.mulf %77, %76 : vector<8x128xf32>
    %79 = arith.negf %78 : vector<8x128xf32>
    %80 = math.exp %79 : vector<8x128xf32>
    %cst_32 = arith.constant 1.000000e+00 : f32
    %81 = vector.broadcast %cst_32 : f32 to vector<8x128xf32>
    %82 = arith.addf %81, %80 : vector<8x128xf32>
    %83 = arith.divf %81, %82 : vector<8x128xf32>
    %cst_33 = arith.constant 2.000000e+00 : f32
    %84 = vector.broadcast %cst_33 : f32 to vector<8x128xf32>
    %85 = arith.mulf %84, %83 : vector<8x128xf32>
    %cst_34 = arith.constant 1.000000e+00 : f32
    %86 = vector.broadcast %cst_34 : f32 to vector<8x128xf32>
    %87 = arith.subf %85, %86 : vector<8x128xf32>
    %88 = arith.mulf %73, %87 : vector<8x128xf32>
    %c4_i32_35 = arith.constant 4 : i32
    %89 = arith.muli %arg1, %c4_i32_35 : i32
    %90 = arith.addi %89, %c1_i32 : i32
    %c10_i32_36 = arith.constant 10 : i32
    %91 = arith.cmpi slt, %90, %c10_i32_36 : i32
    %92 = arith.select %91, %88, %52 : vector<8x128xf32>
    %93 = arith.select %91, %76, %53 : vector<8x128xf32>
    %c2_i32 = arith.constant 2 : i32
    %c8_i32_37 = arith.constant 8 : i32
    %94 = arith.muli %c2_i32, %c8_i32_37 : i32
    %95 = tpu.assume_multiple %94, 8 : i32
    %96 = arith.index_cast %95 : i32 to index
    %c0_38 = arith.constant 0 : index
    %97 = vector.load %arg9[%96, %c0_38] : memref<32x512xf32, #tpu.memory_space<vmem>>, vector<8x512xf32>
    %98 = arith.truncf %92 : vector<8x128xf32> to vector<8x128xbf16>
    %cst_39 = arith.constant dense<0.000000e+00> : vector<8x512xf32>
    %99 = tpu.matmul %98, %11, %cst_39 {dimension_numbers = #tpu.dot_dimension_numbers<[1], [0], [0], [1], [0, 0, 1, 1], [], []>} : vector<8x128xbf16>, vector<128x512xbf16>, vector<8x512xf32> -> vector<8x512xf32>
    %100 = arith.addf %97, %99 : vector<8x512xf32>
    %101 = arith.negf %100 : vector<8x512xf32>
    %102 = math.exp %101 : vector<8x512xf32>
    %cst_40 = arith.constant 1.000000e+00 : f32
    %103 = vector.broadcast %cst_40 : f32 to vector<8x512xf32>
    %104 = arith.addf %103, %102 : vector<8x512xf32>
    %105 = arith.divf %103, %104 : vector<8x512xf32>
    %106 = vector.extract_strided_slice %105 {offsets = [0, 0], sizes = [8, 128], strides = [1, 1]} : vector<8x512xf32> to vector<8x128xf32>
    %107 = vector.extract_strided_slice %105 {offsets = [0, 128], sizes = [8, 128], strides = [1, 1]} : vector<8x512xf32> to vector<8x128xf32>
    %108 = vector.extract_strided_slice %105 {offsets = [0, 256], sizes = [8, 128], strides = [1, 1]} : vector<8x512xf32> to vector<8x128xf32>
    %cst_41 = arith.constant 2.000000e+00 : f32
    %109 = vector.broadcast %cst_41 : f32 to vector<8x128xf32>
    %110 = arith.mulf %109, %108 : vector<8x128xf32>
    %cst_42 = arith.constant 1.000000e+00 : f32
    %111 = vector.broadcast %cst_42 : f32 to vector<8x128xf32>
    %112 = arith.subf %110, %111 : vector<8x128xf32>
    %113 = vector.extract_strided_slice %105 {offsets = [0, 384], sizes = [8, 128], strides = [1, 1]} : vector<8x512xf32> to vector<8x128xf32>
    %114 = arith.mulf %107, %93 : vector<8x128xf32>
    %115 = arith.mulf %106, %112 : vector<8x128xf32>
    %116 = arith.addf %114, %115 : vector<8x128xf32>
    %cst_43 = arith.constant 2.000000e+00 : f32
    %117 = vector.broadcast %cst_43 : f32 to vector<8x128xf32>
    %118 = arith.mulf %117, %116 : vector<8x128xf32>
    %119 = arith.negf %118 : vector<8x128xf32>
    %120 = math.exp %119 : vector<8x128xf32>
    %cst_44 = arith.constant 1.000000e+00 : f32
    %121 = vector.broadcast %cst_44 : f32 to vector<8x128xf32>
    %122 = arith.addf %121, %120 : vector<8x128xf32>
    %123 = arith.divf %121, %122 : vector<8x128xf32>
    %cst_45 = arith.constant 2.000000e+00 : f32
    %124 = vector.broadcast %cst_45 : f32 to vector<8x128xf32>
    %125 = arith.mulf %124, %123 : vector<8x128xf32>
    %cst_46 = arith.constant 1.000000e+00 : f32
    %126 = vector.broadcast %cst_46 : f32 to vector<8x128xf32>
    %127 = arith.subf %125, %126 : vector<8x128xf32>
    %128 = arith.mulf %113, %127 : vector<8x128xf32>
    %c4_i32_47 = arith.constant 4 : i32
    %129 = arith.muli %arg1, %c4_i32_47 : i32
    %130 = arith.addi %129, %c2_i32 : i32
    %c10_i32_48 = arith.constant 10 : i32
    %131 = arith.cmpi slt, %130, %c10_i32_48 : i32
    %132 = arith.select %131, %128, %92 : vector<8x128xf32>
    %133 = arith.select %131, %116, %93 : vector<8x128xf32>
    %c3_i32 = arith.constant 3 : i32
    %c8_i32_49 = arith.constant 8 : i32
    %134 = arith.muli %c3_i32, %c8_i32_49 : i32
    %135 = tpu.assume_multiple %134, 8 : i32
    %136 = arith.index_cast %135 : i32 to index
    %c0_50 = arith.constant 0 : index
    %137 = vector.load %arg9[%136, %c0_50] : memref<32x512xf32, #tpu.memory_space<vmem>>, vector<8x512xf32>
    %138 = arith.truncf %132 : vector<8x128xf32> to vector<8x128xbf16>
    %cst_51 = arith.constant dense<0.000000e+00> : vector<8x512xf32>
    %139 = tpu.matmul %138, %11, %cst_51 {dimension_numbers = #tpu.dot_dimension_numbers<[1], [0], [0], [1], [0, 0, 1, 1], [], []>} : vector<8x128xbf16>, vector<128x512xbf16>, vector<8x512xf32> -> vector<8x512xf32>
    %140 = arith.addf %137, %139 : vector<8x512xf32>
    %141 = arith.negf %140 : vector<8x512xf32>
    %142 = math.exp %141 : vector<8x512xf32>
    %cst_52 = arith.constant 1.000000e+00 : f32
    %143 = vector.broadcast %cst_52 : f32 to vector<8x512xf32>
    %144 = arith.addf %143, %142 : vector<8x512xf32>
    %145 = arith.divf %143, %144 : vector<8x512xf32>
    %146 = vector.extract_strided_slice %145 {offsets = [0, 0], sizes = [8, 128], strides = [1, 1]} : vector<8x512xf32> to vector<8x128xf32>
    %147 = vector.extract_strided_slice %145 {offsets = [0, 128], sizes = [8, 128], strides = [1, 1]} : vector<8x512xf32> to vector<8x128xf32>
    %148 = vector.extract_strided_slice %145 {offsets = [0, 256], sizes = [8, 128], strides = [1, 1]} : vector<8x512xf32> to vector<8x128xf32>
    %cst_53 = arith.constant 2.000000e+00 : f32
    %149 = vector.broadcast %cst_53 : f32 to vector<8x128xf32>
    %150 = arith.mulf %149, %148 : vector<8x128xf32>
    %cst_54 = arith.constant 1.000000e+00 : f32
    %151 = vector.broadcast %cst_54 : f32 to vector<8x128xf32>
    %152 = arith.subf %150, %151 : vector<8x128xf32>
    %153 = vector.extract_strided_slice %145 {offsets = [0, 384], sizes = [8, 128], strides = [1, 1]} : vector<8x512xf32> to vector<8x128xf32>
    %154 = arith.mulf %147, %133 : vector<8x128xf32>
    %155 = arith.mulf %146, %152 : vector<8x128xf32>
    %156 = arith.addf %154, %155 : vector<8x128xf32>
    %cst_55 = arith.constant 2.000000e+00 : f32
    %157 = vector.broadcast %cst_55 : f32 to vector<8x128xf32>
    %158 = arith.mulf %157, %156 : vector<8x128xf32>
    %159 = arith.negf %158 : vector<8x128xf32>
    %160 = math.exp %159 : vector<8x128xf32>
    %cst_56 = arith.constant 1.000000e+00 : f32
    %161 = vector.broadcast %cst_56 : f32 to vector<8x128xf32>
    %162 = arith.addf %161, %160 : vector<8x128xf32>
    %163 = arith.divf %161, %162 : vector<8x128xf32>
    %cst_57 = arith.constant 2.000000e+00 : f32
    %164 = vector.broadcast %cst_57 : f32 to vector<8x128xf32>
    %165 = arith.mulf %164, %163 : vector<8x128xf32>
    %cst_58 = arith.constant 1.000000e+00 : f32
    %166 = vector.broadcast %cst_58 : f32 to vector<8x128xf32>
    %167 = arith.subf %165, %166 : vector<8x128xf32>
    %168 = arith.mulf %153, %167 : vector<8x128xf32>
    %c4_i32_59 = arith.constant 4 : i32
    %169 = arith.muli %arg1, %c4_i32_59 : i32
    %170 = arith.addi %169, %c3_i32 : i32
    %c10_i32_60 = arith.constant 10 : i32
    %171 = arith.cmpi slt, %170, %c10_i32_60 : i32
    %172 = arith.select %171, %168, %132 : vector<8x128xf32>
    %173 = arith.select %171, %156, %133 : vector<8x128xf32>
    %c4_i32_61 = arith.constant 4 : i32
    %c0_62 = arith.constant 0 : index
    %c0_63 = arith.constant 0 : index
    %174 = vector.load %arg10[%c0_62, %c0_63] : memref<8x128xf32, #tpu.memory_space<vmem>>, vector<8x128xf32>
    tpu.vector_store %arg10[%c0_62, %c0_63], %172 {strides = array<i32>} : memref<8x128xf32, #tpu.memory_space<vmem>>, vector<8x128xf32>,
    %c0_64 = arith.constant 0 : index
    %c0_65 = arith.constant 0 : index
    %175 = vector.load %arg11[%c0_64, %c0_65] : memref<8x128xf32, #tpu.memory_space<vmem>>, vector<8x128xf32>
    tpu.vector_store %arg11[%c0_64, %c0_65], %173 {strides = array<i32>} : memref<8x128xf32, #tpu.memory_space<vmem>>, vector<8x128xf32>,
    %c2_i32_66 = arith.constant 2 : i32
    %176 = arith.cmpi eq, %arg1, %c2_i32_66 : i32
    %177 = arith.extui %176 : i1 to i32
    %c0_i32_67 = arith.constant 0 : i32
    %178 = arith.cmpi ne, %177, %c0_i32_67 : i32
    scf.if %178 {
      %179 = arith.truncf %172 : vector<8x128xf32> to vector<8x128xbf16>
      %c0_68 = arith.constant 0 : index
      %c0_69 = arith.constant 0 : index
      %180 = vector.load %arg6[%c0_68, %c0_69] : memref<128x128xbf16, #tpu.memory_space<vmem>>, vector<128x128xbf16>
      %cst_70 = arith.constant dense<0.000000e+00> : vector<8x128xf32>
      %181 = tpu.matmul %179, %180, %cst_70 {dimension_numbers = #tpu.dot_dimension_numbers<[1], [0], [0], [1], [0, 0, 1, 1], [], []>} : vector<8x128xbf16>, vector<128x128xbf16>, vector<8x128xf32> -> vector<8x128xf32>
      %c0_71 = arith.constant 0 : index
      %c0_72 = arith.constant 0 : index
      %182 = vector.load %arg7[%c0_71, %c0_72] : memref<1x128xf32, #tpu.memory_space<vmem>>, vector<1x128xf32>
      %183 = vector.broadcast %182 : vector<1x128xf32> to vector<8x128xf32>
      %184 = arith.addf %181, %183 : vector<8x128xf32>
      %c0_73 = arith.constant 0 : index
      %c0_74 = arith.constant 0 : index
      %185 = vector.load %arg8[%c0_73, %c0_74] : memref<8x128xf32, #tpu.memory_space<vmem>>, vector<8x128xf32>
      tpu.vector_store %arg8[%c0_73, %c0_74], %184 {strides = array<i32>} : memref<8x128xf32, #tpu.memory_space<vmem>>, vector<8x128xf32>,
    } else {
    }
    return
  }
  func.func @transform_0(%arg0: i32, %arg1: i32) -> (i32, i32, i32) {
    %c0_i32 = arith.constant 0 : i32
    %c0_i32_0 = arith.constant 0 : i32
    return %arg0, %arg1, %c0_i32 : i32, i32, i32
  }
  func.func @transform_1(%arg0: i32, %arg1: i32) -> (i32, i32) {
    %c0_i32 = arith.constant 0 : i32
    %c0_i32_0 = arith.constant 0 : i32
    %c0_i32_1 = arith.constant 0 : i32
    return %c0_i32, %c0_i32_0 : i32, i32
  }
  func.func @transform_2(%arg0: i32, %arg1: i32) -> (i32, i32) {
    %c0_i32 = arith.constant 0 : i32
    %c0_i32_0 = arith.constant 0 : i32
    %c0_i32_1 = arith.constant 0 : i32
    return %c0_i32, %c0_i32_0 : i32, i32
  }
  func.func @transform_3(%arg0: i32, %arg1: i32) -> (i32, i32) {
    %c0_i32 = arith.constant 0 : i32
    %c0_i32_0 = arith.constant 0 : i32
    %c0_i32_1 = arith.constant 0 : i32
    return %c0_i32, %c0_i32_0 : i32, i32
  }
  func.func @transform_4(%arg0: i32, %arg1: i32) -> (i32, i32) {
    %c0_i32 = arith.constant 0 : i32
    %c0_i32_0 = arith.constant 0 : i32
    %c0_i32_1 = arith.constant 0 : i32
    return %c0_i32, %c0_i32_0 : i32, i32
  }
  func.func @transform_5(%arg0: i32, %arg1: i32) -> (i32, i32) {
    %c0_i32 = arith.constant 0 : i32
    %c0_i32_0 = arith.constant 0 : i32
    %c0_i32_1 = arith.constant 0 : i32
    return %c0_i32, %c0_i32_0 : i32, i32
  }
  func.func @transform_6(%arg0: i32, %arg1: i32) -> (i32, i32) {
    %c0_i32 = arith.constant 0 : i32
    %c0_i32_0 = arith.constant 0 : i32
    return %arg0, %c0_i32 : i32, i32
  }
}

</mosaic_0001>

<bundles_post_ra>
// kernel: tpu_custom_call.1
= control target key start
LH: loop header
LB: loop body
LE: loop exit
PB: predicated region body
PF: predicated region fallthrough
CT: control target
= control target key end

     0   :  { %11 = vsyncpa [#allocation6], 0  ;;  %s2509_s0 = inlined_call_operand.vmem [shape: bf16[1,96,4], index: 0, kind: input, shape index: {}]   ;;  %s2510_s1 = inlined_call_operand.hbm [shape: bf16[4,512], index: 1, kind: input, shape index: {}]   ;;  %s2511_s2 = inlined_call_operand.hbm [shape: bf16[128,512], index: 2, kind: input, shape index: {}]   ;;  %s2512_s3 = inlined_call_operand.hbm [shape: f32[1,512], index: 3, kind: input, shape index: {}]   ;;  %s2513_s4 = inlined_call_operand.vmem [shape: bf16[128,128], index: 4, kind: input, shape index: {}]   ;;  %s2514_s5 = inlined_call_operand.vmem [shape: f32[1,128], index: 5, kind: input, shape index: {}]   ;;  %s2515_s6 = inlined_call_operand.hbm [shape: f32[8,128], index: 6, kind: output, shape index: {}]  }
   0x1   :  { %12 = vsyncpa [#allocation9], 0 }
   0x2   :  { %13 = vsyncpa [#allocation7], 0  ;;  %s2012_s21 = smov 0   ;;  %s2014_s22 = smov 0  }
   0x3   :  { %s2016_s23 = smov 0  }
   0x4 LB: > { %s1966_s24 = smov [#allocation8]   ;;  %s1487_s26 = sadd.s32 4294967295, %s1964_s23   ;;  %s1964_s23 = sphi %s2016_s23, %s19_s23   ;;  %s1960_s22 = sphi %s2014_s22, %s2549_s22   ;;  %s1956_s21 = sphi %s2012_s21, %s2548_s21  }
   0x5   : > { %s218_s25 = sshll.u32 %s1966_s24, 4  ;;  %p1488_p0 = scmp.ge.s32.totalorder %s1964_s23, 1  ;;  %s2036_s25 = int_to_ptr.vmem [resolvable:$true] %s218_s25 }
   0x6   : > { %p195_p1 = scmp.lt.s32.totalorder %s1964_s23, 4  ;;  %p2032_p2 = scmp.eq.s32.totalorder %s1487_s26, 0 }
   0x7   : > { %s28_s30 = sadd.s32 1, %s1960_s22  ;;  %s1967_s8 = smov [#allocation5]  }
   0x8   : > { %s2521_s27 = scalar_select %p2032_p2, 1, 0 }
   0x9   : > { %p2038_p3 = pnand %p1488_p0, %p195_p1  ;;  %p2051_p6 = scmp.ge.s32.totalorder %s28_s30, 3 }
   0xa   : > { %s208_s9 = sshll.u32 %s1967_s8, 4  ;;  %s1820_s12 = scalar_lea.hbm %s2511_s2, 4096  ;;  %s209_s9 = int_to_ptr.vmem [resolvable:$true] %s208_s9 }
   0xb   : > { %s2522_s28 = scalar_select %p2038_p3, 1, 0 }
   0xc   : > { %p1628_p4 = pneg %p2038_p3  ;;  %p1821_p7 = scmp.ne.s32.totalorder %s2511_s2, %s1820_s12 }
   0xd   : > { %p1827_p11 = scmp.lt.u32.totalorder %s1820_s12, %s2511_s2 }
   0xe   : > { %p2046_p5 = pnand %p2032_p2, %p1628_p4 }
  0x10   : > { %p2063_p8 = pneg %p2046_p5 }
  0x12   : > { %p1823_p9 = pnand %p2063_p8, %p1821_p7 }
  0x14   : > { %p1824_p10 = pneg %p1823_p9 }
  0x16   : > { %p1829_p12 = pnand %p1827_p11, %p1824_p10 }
  0x18   : > { %1832 = shalt.err (!%p1829_p12)
}
  0x19   : > { %s1833_s18 = scalar_lea.vmem %s2036_s25, 4096  ;;  %p1841_p4 = scmp.lt.s32.totalorder %s2036_s25, %s2036_s25 }
  0x1a   : > { %p1834_p13 = scmp.ne.s32.totalorder %s2036_s25, %s1833_s18  ;;  %p1842_p2 = scmp.lt.s32.totalorder %s1833_s18, %s1833_s18 }
  0x1c   : > { %p1836_p0 = pnand %p1834_p13, %p2063_p8  ;;  %p1843_p7 = por %p1842_p2, %p1841_p4 }
  0x1e   : > { %p1837_p1 = pneg %p1836_p0 }
  0x20   : > { %p1844_p9 = pnand %p1843_p7, %p1837_p1 }
  0x22   : > { %1847 = shalt.err (!%p1844_p9)
}
  0x23   : > { %s1968_s19 = smov 256   ;;  %s1969_s20 = smov 16  }
  0x24   : > { %1634 = dma.hbm_to_vmem [thread:$0]  (!%p2046_p5), %s2511_s2, 4096, %s2036_s25, [#allocation9], %s1968_s19, %s1968_s19, %s1969_s20  }
  0x25   : > { %s2551_s30 = smov (%p2051_p6, %s28_s30), 0  ;;  %s1848_s12 = scalar_lea.hbm %s2510_s1, 128 }
  0x26   : > { %p1849_p2 = scmp.ne.s32.totalorder %s2510_s1, %s1848_s12  ;;  %p1855_p12 = scmp.lt.u32.totalorder %s1848_s12, %s2510_s1 }
  0x28   : > { %p1851_p10 = pnand %p1849_p2, %p2063_p8 }
  0x2a   : > { %p1852_p11 = pneg %p1851_p10 }
  0x2c   : > { %p1857_p13 = pnand %p1855_p12, %p1852_p11 }
  0x2e   : > { %1860 = shalt.err (!%p1857_p13)
}
  0x2f   : > { %s1861_s25 = scalar_lea.vmem %s209_s9, 128  ;;  %p1869_p4 = scmp.lt.s32.totalorder %s209_s9, %s209_s9 }
  0x30   : > { %p1862_p6 = scmp.ne.s32.totalorder %s209_s9, %s1861_s25  ;;  %p1870_p7 = scmp.lt.s32.totalorder %s1861_s25, %s1861_s25 }
  0x32   : > { %p1864_p0 = pnand %p1862_p6, %p2063_p8  ;;  %p1871_p9 = por %p1870_p7, %p1869_p4 }
  0x34   : > { %p1865_p1 = pneg %p1864_p0 }
  0x36   : > { %p1872_p3 = pnand %p1871_p9, %p1865_p1 }
  0x38   : > { %1875 = shalt.err (!%p1872_p3)
}
  0x39   : > { %1631 = dma.hbm_to_vmem [thread:$0]  (!%p2046_p5), %s2510_s1, 128, %s209_s9, [#allocation6]  }
  0x3a   : > { %s1970_s19 = smov [#allocation10]   ;;  %s1876_s10 = scalar_lea.hbm %s2512_s3, 64 }
  0x3b   : > { %s232_s20 = sshll.u32 %s1970_s19, 4  ;;  %p1877_p2 = scmp.ne.s32.totalorder %s2512_s3, %s1876_s10  ;;  %s233_s20 = int_to_ptr.vmem [resolvable:$true] %s232_s20 }
  0x3c   : > { %p1883_p11 = scmp.lt.u32.totalorder %s1876_s10, %s2512_s3 }
  0x3d   : > { %p1879_p3 = pnand %p1877_p2, %p2063_p8 }
  0x3f   : > { %p1880_p10 = pneg %p1879_p3 }
  0x41   : > { %p1885_p12 = pnand %p1883_p11, %p1880_p10 }
  0x43   : > { %1888 = shalt.err (!%p1885_p12)
}
  0x44   : > { %s1889_s9 = scalar_lea.vmem %s233_s20, 64  ;;  %p1897_p1 = scmp.lt.s32.totalorder %s233_s20, %s233_s20 }
  0x45   : > { %p1890_p13 = scmp.ne.s32.totalorder %s233_s20, %s1889_s9  ;;  %p1898_p4 = scmp.lt.s32.totalorder %s1889_s9, %s1889_s9 }
  0x47   : > { %p1892_p6 = pnand %p1890_p13, %p2063_p8  ;;  %p1899_p7 = por %p1898_p4, %p1897_p1 }
  0x49   : > { %p1893_p0 = pneg %p1892_p6 }
  0x4b   : > { %p1900_p9 = pnand %p1899_p7, %p1893_p0 }
  0x4d   : > { %1903 = shalt.err (!%p1900_p9)
}
  0x4e   : > { %1637 = dma.hbm_to_vmem [thread:$0]  (!%p2046_p5), %s2512_s3, 64, %s233_s20, [#allocation9]  }
  0x4f   : > { %p2526_p2 = scmp.ne.s32.totalorder %s2522_s28, 0 }
  0x51   : > { %264 = sbr.rel (%p2526_p2) target bundleno = 1533 (0x5fd), region = 44 }
  0x58   : > { %p2527_p3 = scmp.ne.s32.totalorder %s2521_s27, 0 }
  0x5a   : > { %1943 = dma.done.wait (%p2527_p3), [#allocation6], 128  }
  0x5b   : > { %1945 = vsyncadd (%p2527_p3), [#allocation6], 4294967168 }
  0x5c   : > { %1947 = dma.done.wait (%p2527_p3), [#allocation9], 4160  }
  0x5d   : > { %1949 = vsyncadd (%p2527_p3), [#allocation9], 4294963136  ;;  %s2135_s29 = sshll.u32 %s1956_s21, 2  ;;  %p1499_p8 = scmp.ne.s32.totalorder %s1956_s21, 0 }
  0x5e   : > { %p304_p5 = scmp.lt.s32.totalorder %s2135_s29, 11  ;;  %v1971_v0 = vmov (!%p1499_p8), 0.0  }
  0x5f   : > { %315 = sbr.rel (%p1499_p8) target bundleno = 102 (0x66), region = 60  ;;  %316 = vst [vmem:[#allocation3] sm:$0xff] (!%p1499_p8), %v1971_v0  ;;  %317 = vst [vmem:[#allocation4] sm:$0xff] (!%p1499_p8), %v1971_v0 }
  0x60   : > { %s305_s28 = scalar_select %p304_p5, %s2135_s29, 11 }
  0x62   : > { %s1498_s15 = sshll.u32 %s305_s28, 2 }
  0x63   : > { %s2142_s18 = scalar_lea.vmem %s2509_s0, %s1498_s15 }
  0x66 PF: > { %v322_v1 = vld [vmem:[#allocation5] sm:$0xff]  ;;  %v325_v2 = vlaneseq  ;;  %v1972_v3 = vmov 1983009808   ;;  %v2519_v5 = vmov 0   ;;  %vm380_vm0 = vcmask 1041408   ;;  %v1682_v18 = vld [vmem:[%s2142_s18] sm:$0xff]  }
  0x67   : > { %v358_v4 = vunpack.c.l.s4 %v1972_v3  ;;  %478 = vmatprep.mubr.bf16.mxu1 %v2519_v5  ;;  %425 = vmatprep.mubr.bf16.mxu0 %v2519_v5  ;;  %v356_v8 = vcombine.high %v322_v1, %v322_v1  ;;  %v2150_v16 = vld [vmem:[#allocation8 + $0x4] ss:$16 sps:$4 sm:$0xff]   ;;  %v2152_v17 = vld [vmem:[#allocation8 + $0xc] ss:$16 sps:$4 sm:$0xff]   ;;  %v2155_v19 = vld [vmem:[#allocation8] ss:$16 sps:$4 sm:$0xff]  }
  0x68   : > { %v2147_v6 = vshrl.u32 %v325_v2, 7  ;;  %vm373_vm1 = vcmask 31744   ;;  %v2157_v20 = vld [vmem:[#allocation8 + $0x8] ss:$16 sps:$4 sm:$0xff]   ;;  %v2159_v21 = vld [vmem:[#allocation8 + $0x24] ss:$16 sps:$4 sm:$0xff]  }
  0x69   : > { %v359_v7 = vunpack.c.0.s8 %v358_v4  ;;  %v2163_v22 = vld [vmem:[#allocation8 + $0x2c] ss:$16 sps:$4 sm:$0xff]   ;;  %v2165_v23 = vld [vmem:[#allocation8 + $0x20] ss:$16 sps:$4 sm:$0xff]   ;;  %v2169_v24 = vld [vmem:[#allocation8 + $0x28] ss:$16 sps:$4 sm:$0xff]  }
  0x6a   : > { %v2173_v25 = vld [vmem:[#allocation8 + $0x44] ss:$16 sps:$4 sm:$0xff]   ;;  %v2177_v26 = vld [vmem:[#allocation8 + $0x4c] ss:$16 sps:$4 sm:$0xff]   ;;  %v2179_v27 = vld [vmem:[#allocation8 + $0x40] ss:$16 sps:$4 sm:$0xff]  }
  0x6b   : > { %v362_v9 = vsub.s32 %v359_v7, %v2147_v6  ;;  %v1717_v28 = vld [vmem:[%s2142_s18 + $0x8] sm:$0xff]   ;;  %v2186_v29 = vld [vmem:[#allocation8 + $0x48] ss:$16 sps:$4 sm:$0xff]   ;;  %v2192_v31 = vld [vmem:[#allocation8 + $0x6c] ss:$16 sps:$4 sm:$0xff]   ;;  %v335_v52 = vsub.s32 2, %v2147_v6 }
  0x6c   : > { %v2190_v30 = vld [vmem:[#allocation8 + $0x64] ss:$16 sps:$4 sm:$0xff]   ;;  %v2198_v32 = vld [vmem:[#allocation8 + $0x60] ss:$16 sps:$4 sm:$0xff]   ;;  %v2200_v33 = vld [vmem:[#allocation8 + $0x68] ss:$16 sps:$4 sm:$0xff]  }
  0x6d   : > { %v363_v10 = vrot.slane %v322_v1, %v362_v9  ;;  %v370_v11 = vrot.slane %v356_v8, %v362_v9  ;;  %v2204_v34 = vld [vmem:[#allocation8 + $0x84] ss:$16 sps:$4 sm:$0xff]   ;;  %v2206_v35 = vld [vmem:[#allocation8 + $0x8c] ss:$16 sps:$4 sm:$0xff]   ;;  %v2212_v36 = vld [vmem:[#allocation8 + $0x80] ss:$16 sps:$4 sm:$0xff]  }
  0x6e   : > { %v2214_v37 = vld [vmem:[#allocation8 + $0x88] ss:$16 sps:$4 sm:$0xff]   ;;  %v2218_v38 = vld [vmem:[#allocation8 + $0xa4] ss:$16 sps:$4 sm:$0xff]   ;;  %v2220_v39 = vld [vmem:[#allocation8 + $0xac] ss:$16 sps:$4 sm:$0xff]  }
  0x6f   : > { %v371_v12 = vcombine.high %v363_v10, %v363_v10  ;;  %v372_v13 = vcombine.high %v370_v11, %v370_v11  ;;  %v382_v14 = vsel %vm380_vm0, %v363_v10, 0  ;;  %v388_v15 = vsel %vm380_vm0, %v370_v11, 0  ;;  %v2224_v40 = vld [vmem:[#allocation8 + $0xa0] ss:$16 sps:$4 sm:$0xff]   ;;  %v2226_v41 = vld [vmem:[#allocation8 + $0xa8] ss:$16 sps:$4 sm:$0xff]  }
  0x70   : > { %v2230_v42 = vld [vmem:[#allocation8 + $0xc4] ss:$16 sps:$4 sm:$0xff]   ;;  %v2232_v43 = vld [vmem:[#allocation8 + $0xcc] ss:$16 sps:$4 sm:$0xff]   ;;  %v2236_v44 = vld [vmem:[#allocation8 + $0xc0] ss:$16 sps:$4 sm:$0xff]  }
  0x71   : > { %1502 = vmatprep.subr.msk.bf16.mxu0 %vm380_vm0, %v371_v12  ;;  %1505 = vmatprep.subr.msk.bf16.mxu1 %vm380_vm0, %v372_v13  ;;  %v2238_v45 = vld [vmem:[#allocation8 + $0xc8] ss:$16 sps:$4 sm:$0xff]   ;;  %v2242_v46 = vld [vmem:[#allocation8 + $0xe4] ss:$16 sps:$4 sm:$0xff]   ;;  %v2244_v47 = vld [vmem:[#allocation8 + $0xec] ss:$16 sps:$4 sm:$0xff]  }
  0x72   : > { %394 = vmatpush1.bf16.msra.mxu0 %v382_v14  ;;  %447 = vmatpush1.bf16.msra.mxu1 %v388_v15  ;;  %v2248_v48 = vld [vmem:[#allocation8 + $0xe0] ss:$16 sps:$4 sm:$0xff]   ;;  %v2250_v49 = vld [vmem:[#allocation8 + $0xe8] ss:$16 sps:$4 sm:$0xff]   ;;  %v327_v53 = vsub.s32 0, %v2147_v6  ;;  %v331_v55 = vsub.s32 1, %v2147_v6 }
  0x73   : > { %717 = vmatprep.subr.bf16.mxu0 %v2150_v16  ;;  %758 = vmatprep.subr.bf16.mxu1 %v2152_v17  ;;  %v2252_v50 = vld [vmem:[#allocation3] sm:$0xff]  ;;  %v323_v54 = vld [vmem:[#allocation10] sm:$0xf]  ;;  %v339_v56 = vsub.s32 3, %v2147_v6  ;;  %p843_p10 = scmp.lt.s32.totalorder %s2135_s29, 10  ;;  %s982_s19 = sadd.s32 1, %s2135_s29 }
  0x74   : > { %v556_v51 = vpack.c.bf16 %v2252_v50, %v2252_v50  ;;  %v336_v57 = vrot.slane %v323_v54, %v335_v52  ;;  %v328_v58 = vrot.slane %v323_v54, %v327_v53  ;;  %v332_v61 = vrot.slane %v323_v54, %v331_v55  ;;  %p983_p11 = scmp.lt.s32.totalorder %s982_s19, 10  ;;  %s1122_s24 = sadd.s32 2, %s2135_s29 }
  0x75   : > { %1506 = vmatmul.mubr.msk.bf16.vlgmr.msra.gmra.mrb[0].mxu1 %vm373_vm1, %v1682_v18  ;;  %1503 = vmatmul.mubr.msk.bf16.vlgmr.msra.gmra.mrb[0].mxu0 %vm373_vm1, %v1682_v18  ;;  %v340_v0 = vrot.slane %v323_v54, %v339_v56  ;;  %s844_s27 = scalar_select %p843_p10, 1, 0 }
  0x76   : > { %718 = vmatpush1.bf16.msra.mxu0 %v2155_v19  ;;  %759 = vmatpush1.bf16.msra.mxu1 %v2157_v20  ;;  %s984_s20 = scalar_select %p983_p11, 1, 0 }
  0x77   : > { %719 = vmatprep.subr.bf16.mxu0 %v2159_v21  ;;  %760 = vmatprep.subr.bf16.mxu1 %v2163_v22  ;;  %p1123_p12 = scmp.lt.s32.totalorder %s1122_s24, 10  ;;  %s1262_s10 = sadd.s32 3, %s2135_s29 }
  0x78   : > { %488 = vmatprep.mubr.bf16.mxu1 %v2519_v5  ;;  %435 = vmatprep.mubr.bf16.mxu0 %v2519_v5  ;;  %p1263_p13 = scmp.lt.s32.totalorder %s1262_s10, 10  ;;  %p1569_p6 = scmp.ne.s32.totalorder %s1956_s21, 2 }
  0x79   : > { %s1124_s8 = scalar_select %p1123_p12, 1, 0 }
  0x7a   : > { %720 = vmatpush1.bf16.msra.mxu0 %v2165_v23  ;;  %761 = vmatpush1.bf16.msra.mxu1 %v2169_v24  ;;  %s1264_s11 = scalar_select %p1263_p13, 1, 0 }
  0x7b   : > { %721 = vmatprep.subr.bf16.mxu0 %v2173_v25  ;;  %762 = vmatprep.subr.bf16.mxu1 %v2177_v26  ;;  %vm1975_vm6 = vmmov (!%p1569_p6), 0  }
  0x7d   : > { %1507 = vmatmul.mubr.msk.bf16.gmra.mrb[4].mxu1 %vm373_vm1, %v1717_v28  ;;  %1504 = vmatmul.mubr.msk.bf16.gmra.mrb[4].mxu0 %vm373_vm1, %v1717_v28 }
  0x7e   : > { %722 = vmatpush1.bf16.msra.mxu0 %v2179_v27  ;;  %763 = vmatpush1.bf16.msra.mxu1 %v2186_v29 }
  0x7f   : > { %723 = vmatprep.subr.bf16.mxu0 %v2190_v30  ;;  %764 = vmatprep.subr.bf16.mxu1 %v2192_v31 }
  0x80   : > { %749 = vmatprep.mubr.bf16.mxu0 %v2519_v5  ;;  %790 = vmatprep.mubr.bf16.mxu1 %v2519_v5 }
  0x82   : > { %724 = vmatpush1.bf16.msra.mxu0 %v2198_v32  ;;  %765 = vmatpush1.bf16.msra.mxu1 %v2200_v33 }
  0x83   : > { %725 = vmatprep.subr.bf16.mxu0 %v2204_v34  ;;  %766 = vmatprep.subr.bf16.mxu1 %v2206_v35 }
  0x86   : > { %726 = vmatpush1.bf16.msra.mxu0 %v2212_v36  ;;  %767 = vmatpush1.bf16.msra.mxu1 %v2214_v37 }
  0x87   : > { %727 = vmatprep.subr.bf16.mxu0 %v2218_v38  ;;  %768 = vmatprep.subr.bf16.mxu1 %v2220_v39 }
  0x8a   : > { %728 = vmatpush1.bf16.msra.mxu0 %v2224_v40  ;;  %769 = vmatpush1.bf16.msra.mxu1 %v2226_v41 }
  0x8b   : > { %729 = vmatprep.subr.bf16.mxu0 %v2230_v42  ;;  %770 = vmatprep.subr.bf16.mxu1 %v2232_v43 }
  0x8e   : > { %730 = vmatpush1.bf16.msra.mxu0 %v2236_v44  ;;  %771 = vmatpush1.bf16.msra.mxu1 %v2238_v45 }
  0x8f   : > { %731 = vmatprep.subr.bf16.mxu0 %v2242_v46  ;;  %772 = vmatprep.subr.bf16.mxu1 %v2244_v47 }
  0x92   : > { %732 = vmatpush1.bf16.msra.mxu0 %v2248_v48  ;;  %773 = vmatpush1.bf16.msra.mxu1 %v2250_v49 }
  0x93   : > { %857 = vmatprep.subr.bf16.mxu0 %v2150_v16  ;;  %898 = vmatprep.subr.bf16.mxu1 %v2152_v17 }
  0x95   : > { %750 = vmatmul.mubr.bf16.vlgmr.msra.gmra.mrb[8].mxu0 %v556_v51  ;;  %791 = vmatmul.mubr.bf16.vlgmr.msra.gmra.mrb[8].mxu1 %v556_v51 }
  0x96   : > { %858 = vmatpush1.bf16.msra.mxu0 %v2155_v19  ;;  %899 = vmatpush1.bf16.msra.mxu1 %v2157_v20 }
  0x97   : > { %859 = vmatprep.subr.bf16.mxu0 %v2159_v21  ;;  %900 = vmatprep.subr.bf16.mxu1 %v2163_v22 }
  0x98   : > { %889 = vmatprep.mubr.bf16.mxu0 %v2519_v5  ;;  %930 = vmatprep.mubr.bf16.mxu1 %v2519_v5 }
  0x9a   : > { %860 = vmatpush1.bf16.msra.mxu0 %v2165_v23  ;;  %901 = vmatpush1.bf16.msra.mxu1 %v2169_v24 }
  0x9b   : > { %861 = vmatprep.subr.bf16.mxu0 %v2173_v25  ;;  %902 = vmatprep.subr.bf16.mxu1 %v2177_v26 }
  0x9e   : > { %862 = vmatpush1.bf16.msra.mxu0 %v2179_v27  ;;  %903 = vmatpush1.bf16.msra.mxu1 %v2186_v29 }
  0x9f   : > { %863 = vmatprep.subr.bf16.mxu0 %v2190_v30  ;;  %904 = vmatprep.subr.bf16.mxu1 %v2192_v31 }
  0xa2   : > { %864 = vmatpush1.bf16.msra.mxu0 %v2198_v32  ;;  %905 = vmatpush1.bf16.msra.mxu1 %v2200_v33 }
  0xa3   : > { %865 = vmatprep.subr.bf16.mxu0 %v2204_v34  ;;  %906 = vmatprep.subr.bf16.mxu1 %v2206_v35 }
  0xa6   : > { %866 = vmatpush1.bf16.msra.mxu0 %v2212_v36  ;;  %907 = vmatpush1.bf16.msra.mxu1 %v2214_v37 }
  0xa7   : > { %867 = vmatprep.subr.bf16.mxu0 %v2218_v38  ;;  %908 = vmatprep.subr.bf16.mxu1 %v2220_v39 }
  0xaa   : > { %868 = vmatpush1.bf16.msra.mxu0 %v2224_v40  ;;  %909 = vmatpush1.bf16.msra.mxu1 %v2226_v41 }
  0xab   : > { %869 = vmatprep.subr.bf16.mxu0 %v2230_v42  ;;  %910 = vmatprep.subr.bf16.mxu1 %v2232_v43 }
  0xae   : > { %870 = vmatpush1.bf16.msra.mxu0 %v2236_v44  ;;  %911 = vmatpush1.bf16.msra.mxu1 %v2238_v45 }
  0xaf   : > { %871 = vmatprep.subr.bf16.mxu0 %v2242_v46  ;;  %912 = vmatprep.subr.bf16.mxu1 %v2244_v47 }
  0xb2   : > { %872 = vmatpush1.bf16.msra.mxu0 %v2248_v48  ;;  %913 = vmatpush1.bf16.msra.mxu1 %v2250_v49 }
  0xb3   : > { %997 = vmatprep.subr.bf16.mxu0 %v2150_v16  ;;  %1038 = vmatprep.subr.bf16.mxu1 %v2152_v17 }
 0x148   : > { %v480_v59 = vpop.f32.mrb[0].mxu1  ;;  %v427_v60 = vpop.f32.mrb[0].mxu0 }
 0x149   : > { %v482_v62 = vpop.f32.mrb[1].mxu1  ;;  %v429_v63 = vpop.f32.mrb[1].mxu0 }
 0x14a   : > { %v484_v1 = vpop.f32.mrb[2].mxu1  ;;  %v431_v2 = vpop.f32.mrb[2].mxu0 }
 0x14b   : > { %v2300_v3 = vadd.f32 %v484_v1, %v336_v57  ;;  %v2302_v4 = vadd.f32 %v431_v2, %v328_v58  ;;  %v486_v7 = vpop.f32.mrb[3].mxu1  ;;  %v433_v8 = vpop.f32.mrb[3].mxu0 }
 0x14c   : > { %v2304_v9 = vadd.f32 %v486_v7, %v340_v0  ;;  %v2306_v10 = vadd.f32 %v433_v8, %v332_v61  ;;  %v481_v7 = vadd.f32 %v480_v59, %v336_v57  ;;  %v428_v8 = vadd.f32 %v427_v60, %v328_v58 }
 0x14e   : > { %2528 = vst [vmem:[#allocation15_spill] sm:$0xff] %v2304_v9 }
 0x150   : > { %v490_v6 = vpop.f32.mrb[4].mxu1  ;;  %v437_v11 = vpop.f32.mrb[4].mxu0 }
 0x151   : > { %v2308_v12 = vadd.f32 %v490_v6, %v336_v57  ;;  %v492_v13 = vpop.f32.mrb[5].mxu1  ;;  %v2310_v14 = vadd.f32 %v437_v11, %v328_v58  ;;  %v439_v15 = vpop.f32.mrb[5].mxu0  ;;  %v483_v6 = vadd.f32 %v482_v62, %v340_v0  ;;  %v430_v11 = vadd.f32 %v429_v63, %v332_v61 }
 0x152   : > { %v2312_v18 = vadd.f32 %v492_v13, %v340_v0  ;;  %v494_v28 = vpop.f32.mrb[6].mxu1  ;;  %v2314_v51 = vadd.f32 %v439_v15, %v332_v61  ;;  %v441_v52 = vpop.f32.mrb[6].mxu0 }
 0x153   : > { %2529 = vst [vmem:[#allocation16_spill] sm:$0xff] %v2308_v12  ;;  %2530 = vst [vmem:[#allocation17_spill] sm:$0xff] %v2310_v14  ;;  %v2316_v53 = vadd.f32 %v494_v28, %v336_v57  ;;  %v496_v54 = vpop.f32.mrb[7].mxu1  ;;  %v2318_v55 = vadd.f32 %v441_v52, %v328_v58  ;;  %v443_v56 = vpop.f32.mrb[7].mxu0 }
 0x154   : > { %2531 = vst [vmem:[#allocation18_spill] sm:$0xff] %v2312_v18  ;;  %2532 = vst [vmem:[#allocation19_spill] sm:$0xff] %v2314_v51  ;;  %v2320_v1 = vadd.f32 %v496_v54, %v340_v0  ;;  %v2322_v2 = vadd.f32 %v443_v56, %v332_v61 }
 0x155   : > { %2533 = vst [vmem:[#allocation20_spill] sm:$0xff] %v2316_v53  ;;  %2534 = vst [vmem:[#allocation21_spill] sm:$0xff] %v2318_v55 }
 0x156   : > { %2535 = vst [vmem:[#allocation22_spill] sm:$0xff] %v2320_v1 }
 0x168   : > { %v751_v13 = vpop.f32.mrb[8].mxu0  ;;  %v792_v5 = vpop.f32.mrb[8].mxu1 }
 0x169   : > { %v799_v18 = vadd.f32 %v751_v13, %v428_v8  ;;  %v801_v15 = vadd.f32 %v792_v5, %v481_v7  ;;  %v753_v51 = vpop.f32.mrb[9].mxu0  ;;  %v794_v12 = vpop.f32.mrb[9].mxu1 }
 0x16a   : > { %v800_v28 = vadd.f32 %v753_v51, %v430_v11  ;;  %v802_v53 = vadd.f32 %v794_v12, %v483_v6  ;;  %v755_v14 = vpop.f32.mrb[10].mxu0  ;;  %v796_v52 = vpop.f32.mrb[10].mxu1  ;;  %v548_v12 = vld [vmem:[#allocation4] sm:$0xff] }
 0x16b   : > { %v1540_v55 = vmul.f32 -1.442695, %v799_v18  ;;  %v1542_v9 = vmul.f32 -1.442695, %v801_v15  ;;  %v756_v54 = vpop.f32.mrb[11].mxu0  ;;  %v797_v56 = vpop.f32.mrb[11].mxu1  ;;  %v845_v18 = vstv %s844_s27 }
 0x16c   : > { %v1541_v1 = vmul.f32 -1.442695, %v800_v28  ;;  %vm2325_vm2 = vcmp.eq.s32.totalorder %v845_v18, 1  ;;  %v1543_v8 = vmul.f32 -1.442695, %v802_v53 }
 0x16d   : > { %1732 = vpow2.f32 %v1540_v55 }
 0x16e   : > { %1734 = vpow2.f32 %v1542_v9 }
 0x16f   : > { %1736 = vpow2.f32 %v1541_v1 }
 0x177   : > { %v1733_v57 = vpop.eup %1732 }
 0x178   : > { %v1735_v58 = vpop.eup %1734  ;;  %v815_v61 = vadd.f32 1.0, %v1733_v57 }
 0x179   : > { %v1737_v59 = vpop.eup %1736  ;;  %v817_v60 = vadd.f32 1.0, %v1735_v58 }
 0x17a   : > { %v816_v5 = vadd.f32 1.0, %v1737_v59 }
 0x17b   : > { %1738 = vrcp.f32 %v817_v60 }
 0x17c   : > { %1740 = vrcp.f32 %v816_v5 }
 0x17d   : > { %1742 = vrcp.f32 %v815_v61  ;;  %v2538_v61 = vmov 0  }
 0x17e   : > { %1744 = vpow2.f32 %v1543_v8 }
 0x185   : > { %v1739_v62 = vpop.eup %1738 }
 0x186   : > { %v827_v63 = vmul.f32 2.0, %v1739_v62  ;;  %v1741_v0 = vpop.eup %1740 }
 0x187   : > { %v1743_v51 = vpop.eup %1742  ;;  %v829_v55 = vmul.f32 %v1741_v0, %v548_v12 }
 0x188   : > { %v1544_v14 = vadd.f32 -1.0, %v827_v63  ;;  %v1745_v15 = vpop.eup %1744 }
 0x189   : > { %v818_v54 = vadd.f32 1.0, %v1745_v15 }
 0x18a   : > { %v830_v9 = vmul.f32 %v1743_v51, %v1544_v14  ;;  %v2539_v51 = vld [vmem:[#allocation15_spill] sm:$0xff] }
 0x18c   : > { %v831_v7 = vadd.f32 %v830_v9, %v829_v55 }
 0x18e   : > { %v1545_v6 = vmul.f32 -2.0, %v831_v7  ;;  %v2331_v11 = vsel %vm2325_vm2, %v831_v7, %v548_v12 }
 0x190   : > { %v834_v13 = vmul.f32 1.442695, %v1545_v6 }
 0x192   : > { %1746 = vpow2.f32 %v834_v13 }
 0x19c   : > { %v1747_v28 = vpop.eup %1746 }
 0x19d   : > { %v836_v52 = vadd.f32 1.0, %v1747_v28 }
 0x19f   : > { %1748 = vrcp.f32 %v836_v52 }
 0x1a0   : > { %1750 = vrcp.f32 %v818_v54 }
 0x1a9   : > { %v1749_v56 = vpop.eup %1748 }
 0x1aa   : > { %v839_v57 = vmul.f32 2.0, %v1749_v56  ;;  %v1751_v59 = vpop.eup %1750 }
 0x1ac   : > { %v1546_v58 = vadd.f32 -1.0, %v839_v57 }
 0x1ae   : > { %v841_v60 = vmul.f32 %v1751_v59, %v1546_v58  ;;  %v985_v59 = vstv %s984_s20 }
 0x1af   : > { %vm986_vm3 = vcmp.eq.s32.totalorder %v985_v59, 1 }
 0x1b0   : > { %v2336_v53 = vsel %vm2325_vm2, %v841_v60, %v2252_v50 }
 0x1b1   : > { %v856_v5 = vpack.c.bf16 %v2336_v53, %v2336_v53 }
 0x1b3   : > { %890 = vmatmul.mubr.bf16.vlgmr.msra.gmra.mrb[12].mxu0 %v856_v5  ;;  %931 = vmatmul.mubr.bf16.vlgmr.msra.gmra.mrb[12].mxu1 %v856_v5 }
 0x1b4   : > { %998 = vmatpush1.bf16.msra.mxu0 %v2155_v19  ;;  %1039 = vmatpush1.bf16.msra.mxu1 %v2157_v20 }
 0x1b5   : > { %999 = vmatprep.subr.bf16.mxu0 %v2159_v21  ;;  %1040 = vmatprep.subr.bf16.mxu1 %v2163_v22 }
 0x1b6   : > { %1029 = vmatprep.mubr.bf16.mxu0 %v2538_v61  ;;  %1070 = vmatprep.mubr.bf16.mxu1 %v2538_v61 }
 0x1b8   : > { %1000 = vmatpush1.bf16.msra.mxu0 %v2165_v23  ;;  %1041 = vmatpush1.bf16.msra.mxu1 %v2169_v24 }
 0x1b9   : > { %1001 = vmatprep.subr.bf16.mxu0 %v2173_v25  ;;  %1042 = vmatprep.subr.bf16.mxu1 %v2177_v26 }
 0x1bc   : > { %1002 = vmatpush1.bf16.msra.mxu0 %v2179_v27  ;;  %1043 = vmatpush1.bf16.msra.mxu1 %v2186_v29 }
 0x1bd   : > { %1003 = vmatprep.subr.bf16.mxu0 %v2190_v30  ;;  %1044 = vmatprep.subr.bf16.mxu1 %v2192_v31 }
 0x1c0   : > { %1004 = vmatpush1.bf16.msra.mxu0 %v2198_v32  ;;  %1045 = vmatpush1.bf16.msra.mxu1 %v2200_v33 }
 0x1c1   : > { %1005 = vmatprep.subr.bf16.mxu0 %v2204_v34  ;;  %1046 = vmatprep.subr.bf16.mxu1 %v2206_v35 }
 0x1c4   : > { %1006 = vmatpush1.bf16.msra.mxu0 %v2212_v36  ;;  %1047 = vmatpush1.bf16.msra.mxu1 %v2214_v37 }
 0x1c5   : > { %1007 = vmatprep.subr.bf16.mxu0 %v2218_v38  ;;  %1048 = vmatprep.subr.bf16.mxu1 %v2220_v39 }
 0x1c8   : > { %1008 = vmatpush1.bf16.msra.mxu0 %v2224_v40  ;;  %1049 = vmatpush1.bf16.msra.mxu1 %v2226_v41 }
 0x1c9   : > { %1009 = vmatprep.subr.bf16.mxu0 %v2230_v42  ;;  %1050 = vmatprep.subr.bf16.mxu1 %v2232_v43 }
 0x1cc   : > { %1010 = vmatpush1.bf16.msra.mxu0 %v2236_v44  ;;  %1051 = vmatpush1.bf16.msra.mxu1 %v2238_v45 }
 0x1cd   : > { %1011 = vmatprep.subr.bf16.mxu0 %v2242_v46  ;;  %1052 = vmatprep.subr.bf16.mxu1 %v2244_v47 }
 0x1d0   : > { %1012 = vmatpush1.bf16.msra.mxu0 %v2248_v48  ;;  %1053 = vmatpush1.bf16.msra.mxu1 %v2250_v49 }
 0x1d1   : > { %1137 = vmatprep.subr.bf16.mxu0 %v2150_v16  ;;  %1178 = vmatprep.subr.bf16.mxu1 %v2152_v17 }
 0x286   : > { %v891_v50 = vpop.f32.mrb[12].mxu0  ;;  %v932_v62 = vpop.f32.mrb[12].mxu1 }
 0x287   : > { %v939_v63 = vadd.f32 %v891_v50, %v2302_v4  ;;  %v941_v0 = vadd.f32 %v932_v62, %v2300_v3  ;;  %v893_v12 = vpop.f32.mrb[13].mxu0  ;;  %v934_v14 = vpop.f32.mrb[13].mxu1 }
 0x288   : > { %v940_v18 = vadd.f32 %v893_v12, %v2306_v10  ;;  %v942_v9 = vadd.f32 %v934_v14, %v2539_v51  ;;  %v895_v55 = vpop.f32.mrb[14].mxu0  ;;  %v936_v1 = vpop.f32.mrb[14].mxu1 }
 0x289   : > { %v1548_v7 = vmul.f32 -1.442695, %v939_v63  ;;  %v1550_v8 = vmul.f32 -1.442695, %v941_v0  ;;  %v896_v16 = vpop.f32.mrb[15].mxu0  ;;  %v937_v6 = vpop.f32.mrb[15].mxu1 }
 0x28a   : > { %v1549_v17 = vmul.f32 -1.442695, %v940_v18  ;;  %v1551_v62 = vmul.f32 -1.442695, %v942_v9 }
 0x28b   : > { %1752 = vpow2.f32 %v1548_v7 }
 0x28c   : > { %1754 = vpow2.f32 %v1550_v8 }
 0x28d   : > { %1756 = vpow2.f32 %v1549_v17 }
 0x295   : > { %v1753_v4 = vpop.eup %1752 }
 0x296   : > { %v1755_v13 = vpop.eup %1754  ;;  %v955_v52 = vadd.f32 1.0, %v1753_v4 }
 0x297   : > { %v1757_v3 = vpop.eup %1756  ;;  %v957_v15 = vadd.f32 1.0, %v1755_v13 }
 0x298   : > { %v956_v28 = vadd.f32 1.0, %v1757_v3 }
 0x299   : > { %1758 = vrcp.f32 %v957_v15 }
 0x29a   : > { %1760 = vrcp.f32 %v956_v28 }
 0x29b   : > { %1762 = vrcp.f32 %v955_v52 }
 0x29c   : > { %1764 = vpow2.f32 %v1551_v62 }
 0x2a3   : > { %v1759_v10 = vpop.eup %1758 }
 0x2a4   : > { %v1761_v54 = vpop.eup %1760  ;;  %v967_v56 = vmul.f32 2.0, %v1759_v10 }
 0x2a5   : > { %v969_v57 = vmul.f32 %v1761_v54, %v2331_v11  ;;  %v1763_v60 = vpop.eup %1762 }
 0x2a6   : > { %v1552_v58 = vadd.f32 -1.0, %v967_v56  ;;  %v1765_v14 = vpop.eup %1764 }
 0x2a7   : > { %v958_v55 = vadd.f32 1.0, %v1765_v14 }
 0x2a8   : > { %v970_v5 = vmul.f32 %v1763_v60, %v1552_v58 }
 0x2aa   : > { %v971_v50 = vadd.f32 %v970_v5, %v969_v57 }
 0x2ac   : > { %v1553_v63 = vmul.f32 -2.0, %v971_v50  ;;  %v2382_v0 = vsel %vm986_vm3, %v971_v50, %v2331_v11 }
 0x2ae   : > { %v974_v12 = vmul.f32 1.442695, %v1553_v63 }
 0x2b0   : > { %1766 = vpow2.f32 %v974_v12  ;;  %v2544_v12 = vld [vmem:[#allocation21_spill] sm:$0xff] }
 0x2ba   : > { %v1767_v18 = vpop.eup %1766 }
 0x2bb   : > { %v976_v51 = vadd.f32 1.0, %v1767_v18  ;;  %v2545_v18 = vld [vmem:[#allocation20_spill] sm:$0xff] }
 0x2bd   : > { %1768 = vrcp.f32 %v976_v51 }
 0x2be   : > { %1770 = vrcp.f32 %v958_v55 }
 0x2c7   : > { %v1769_v1 = vpop.eup %1768 }
 0x2c8   : > { %v979_v7 = vmul.f32 2.0, %v1769_v1  ;;  %v1771_v16 = vpop.eup %1770 }
 0x2ca   : > { %v1554_v8 = vadd.f32 -1.0, %v979_v7 }
 0x2cc   : > { %v981_v6 = vmul.f32 %v1771_v16, %v1554_v8  ;;  %v2546_v8 = vld [vmem:[#allocation22_spill] sm:$0xff] }
 0x2ce   : > { %v2386_v9 = vsel %vm986_vm3, %v981_v6, %v2336_v53  ;;  %v1125_v53 = vstv %s1124_s8 }
 0x2cf   : > { %v996_v11 = vpack.c.bf16 %v2386_v9, %v2386_v9  ;;  %vm1126_vm4 = vcmp.eq.s32.totalorder %v1125_v53, 1 }
 0x2d1   : > { %1030 = vmatmul.mubr.bf16.vlgmr.msra.gmra.mrb[16].mxu0 %v996_v11  ;;  %1071 = vmatmul.mubr.bf16.vlgmr.msra.gmra.mrb[16].mxu1 %v996_v11 }
 0x2d2   : > { %1138 = vmatpush1.bf16.msra.mxu0 %v2155_v19  ;;  %1179 = vmatpush1.bf16.msra.mxu1 %v2157_v20 }
 0x2d3   : > { %1139 = vmatprep.subr.bf16.mxu0 %v2159_v21  ;;  %1180 = vmatprep.subr.bf16.mxu1 %v2163_v22  ;;  %v2540_v21 = vld [vmem:[#allocation17_spill] sm:$0xff] }
 0x2d4   : > { %1169 = vmatprep.mubr.bf16.mxu0 %v2538_v61  ;;  %1210 = vmatprep.mubr.bf16.mxu1 %v2538_v61 }
 0x2d6   : > { %1140 = vmatpush1.bf16.msra.mxu0 %v2165_v23  ;;  %1181 = vmatpush1.bf16.msra.mxu1 %v2169_v24  ;;  %v2541_v23 = vld [vmem:[#allocation16_spill] sm:$0xff] }
 0x2d7   : > { %1141 = vmatprep.subr.bf16.mxu0 %v2173_v25  ;;  %1182 = vmatprep.subr.bf16.mxu1 %v2177_v26 }
 0x2da   : > { %1142 = vmatpush1.bf16.msra.mxu0 %v2179_v27  ;;  %1183 = vmatpush1.bf16.msra.mxu1 %v2186_v29  ;;  %v2542_v27 = vld [vmem:[#allocation19_spill] sm:$0xff] }
 0x2db   : > { %1143 = vmatprep.subr.bf16.mxu0 %v2190_v30  ;;  %1184 = vmatprep.subr.bf16.mxu1 %v2192_v31  ;;  %v2543_v30 = vld [vmem:[#allocation18_spill] sm:$0xff] }
 0x2de   : > { %1144 = vmatpush1.bf16.msra.mxu0 %v2198_v32  ;;  %1185 = vmatpush1.bf16.msra.mxu1 %v2200_v33 }
 0x2df   : > { %1145 = vmatprep.subr.bf16.mxu0 %v2204_v34  ;;  %1186 = vmatprep.subr.bf16.mxu1 %v2206_v35 }
 0x2e2   : > { %1146 = vmatpush1.bf16.msra.mxu0 %v2212_v36  ;;  %1187 = vmatpush1.bf16.msra.mxu1 %v2214_v37 }
 0x2e3   : > { %1147 = vmatprep.subr.bf16.mxu0 %v2218_v38  ;;  %1188 = vmatprep.subr.bf16.mxu1 %v2220_v39 }
 0x2e6   : > { %1148 = vmatpush1.bf16.msra.mxu0 %v2224_v40  ;;  %1189 = vmatpush1.bf16.msra.mxu1 %v2226_v41 }
 0x2e7   : > { %1149 = vmatprep.subr.bf16.mxu0 %v2230_v42  ;;  %1190 = vmatprep.subr.bf16.mxu1 %v2232_v43 }
 0x2ea   : > { %1150 = vmatpush1.bf16.msra.mxu0 %v2236_v44  ;;  %1191 = vmatpush1.bf16.msra.mxu1 %v2238_v45 }
 0x2eb   : > { %1151 = vmatprep.subr.bf16.mxu0 %v2242_v46  ;;  %1192 = vmatprep.subr.bf16.mxu1 %v2244_v47 }
 0x2ee   : > { %1152 = vmatpush1.bf16.msra.mxu0 %v2248_v48  ;;  %1193 = vmatpush1.bf16.msra.mxu1 %v2250_v49 }
 0x3a4   : > { %v1031_v19 = vpop.f32.mrb[16].mxu0  ;;  %v1072_v20 = vpop.f32.mrb[16].mxu1 }
 0x3a5   : > { %v1079_v22 = vadd.f32 %v1031_v19, %v2540_v21  ;;  %v1081_v24 = vadd.f32 %v1072_v20, %v2541_v23  ;;  %v1033_v25 = vpop.f32.mrb[17].mxu0  ;;  %v1074_v26 = vpop.f32.mrb[17].mxu1 }
 0x3a6   : > { %v1080_v29 = vadd.f32 %v1033_v25, %v2542_v27  ;;  %v1082_v31 = vadd.f32 %v1074_v26, %v2543_v30  ;;  %v1035_v32 = vpop.f32.mrb[18].mxu0  ;;  %v1076_v33 = vpop.f32.mrb[18].mxu1 }
 0x3a7   : > { %v1555_v34 = vmul.f32 -1.442695, %v1079_v22  ;;  %v1557_v35 = vmul.f32 -1.442695, %v1081_v24  ;;  %v1036_v36 = vpop.f32.mrb[19].mxu0  ;;  %v1077_v37 = vpop.f32.mrb[19].mxu1 }
 0x3a8   : > { %v1556_v38 = vmul.f32 -1.442695, %v1080_v29  ;;  %v1558_v13 = vmul.f32 -1.442695, %v1082_v31 }
 0x3a9   : > { %1772 = vpow2.f32 %v1555_v34  ;;  %v1265_v34 = vstv %s1264_s11 }
 0x3aa   : > { %1774 = vpow2.f32 %v1557_v35  ;;  %vm1266_vm5 = vcmp.eq.s32.totalorder %v1265_v34, 1 }
 0x3ab   : > { %1776 = vpow2.f32 %v1556_v38 }
 0x3b3   : > { %v1773_v39 = vpop.eup %1772 }
 0x3b4   : > { %v1775_v40 = vpop.eup %1774  ;;  %v1095_v44 = vadd.f32 1.0, %v1773_v39 }
 0x3b5   : > { %v1777_v41 = vpop.eup %1776  ;;  %v1097_v42 = vadd.f32 1.0, %v1775_v40 }
 0x3b6   : > { %v1096_v43 = vadd.f32 1.0, %v1777_v41 }
 0x3b7   : > { %1778 = vrcp.f32 %v1097_v42 }
 0x3b8   : > { %1780 = vrcp.f32 %v1096_v43 }
 0x3b9   : > { %1782 = vrcp.f32 %v1095_v44 }
 0x3ba   : > { %1784 = vpow2.f32 %v1558_v13  ;;  %v1813_v13 = vld [vmem:[%s2513_s4 + $0x8] sm:$0xff] (!%p1569_p6)  }
 0x3c1   : > { %v1779_v45 = vpop.eup %1778 }
 0x3c2   : > { %v1781_v46 = vpop.eup %1780  ;;  %v1107_v47 = vmul.f32 2.0, %v1779_v45 }
 0x3c3   : > { %v1109_v48 = vmul.f32 %v1781_v46, %v2382_v0  ;;  %v1783_v61 = vpop.eup %1782 }
 0x3c4   : > { %v1559_v49 = vadd.f32 -1.0, %v1107_v47  ;;  %v1785_v52 = vpop.eup %1784 }
 0x3c5   : > { %v1098_v56 = vadd.f32 1.0, %v1785_v52  ;;  %v1817_v52 = vld [vmem:[%s2513_s4 + $0x28] sm:$0xff] (!%p1569_p6)  }
 0x3c6   : > { %v1110_v17 = vmul.f32 %v1783_v61, %v1559_v49 }
 0x3c8   : > { %v1111_v4 = vadd.f32 %v1110_v17, %v1109_v48  ;;  %v1812_v17 = vld [vmem:[%s2513_s4] sm:$0xff] (!%p1569_p6)  }
 0x3ca   : > { %v1560_v3 = vmul.f32 -2.0, %v1111_v4  ;;  %v1128_v15 = vsel %vm1126_vm4, %v1111_v4, %v2382_v0  ;;  %v1974_v4 = vmov (!%p1569_p6), 0.0  }
 0x3cb   : > { %1592 = vmatprep.subr.bf16.mxu0 (!%p1569_p6), %v1974_v4 }
 0x3cc   : > { %v1114_v28 = vmul.f32 1.442695, %v1560_v3  ;;  %v1814_v3 = vld [vmem:[%s2513_s4 + $0x10] sm:$0xff] (!%p1569_p6)  }
 0x3ce   : > { %1786 = vpow2.f32 %v1114_v28  ;;  %v1816_v28 = vld [vmem:[%s2513_s4 + $0x20] sm:$0xff] (!%p1569_p6)  }
 0x3d8   : > { %v1787_v10 = vpop.eup %1786 }
 0x3d9   : > { %v1116_v54 = vadd.f32 1.0, %v1787_v10  ;;  %v1818_v10 = vld [vmem:[%s2513_s4 + $0x30] sm:$0xff] (!%p1569_p6)  }
 0x3db   : > { %1788 = vrcp.f32 %v1116_v54  ;;  %v1819_v54 = vld [vmem:[%s2513_s4 + $0x38] sm:$0xff] (!%p1569_p6)  }
 0x3dc   : > { %1790 = vrcp.f32 %v1098_v56 }
 0x3e5   : > { %v1789_v57 = vpop.eup %1788 }
 0x3e6   : > { %v1119_v58 = vmul.f32 2.0, %v1789_v57  ;;  %v1791_v60 = vpop.eup %1790  ;;  %v1570_v57 = vld [vmem:[%s2514_s5] ss:$0 sm:$0xff] (!%p1569_p6) }
 0x3e8   : > { %v1561_v59 = vadd.f32 -1.0, %v1119_v58 }
 0x3ea   : > { %v1121_v5 = vmul.f32 %v1791_v60, %v1561_v59 }
 0x3ec   : > { %v2432_v50 = vsel %vm1126_vm4, %v1121_v5, %v2386_v9 }
 0x3ed   : > { %v1136_v62 = vpack.c.bf16 %v2432_v50, %v2432_v50 }
 0x3ef   : > { %1170 = vmatmul.mubr.bf16.vlgmr.msra.gmra.mrb[20].mxu0 %v1136_v62  ;;  %1211 = vmatmul.mubr.bf16.vlgmr.msra.gmra.mrb[20].mxu1 %v1136_v62 }
 0x3f0   : > { %1593 = vmatpush3.bf16.msra.mxu0 (!%p1569_p6), %v1812_v17  ;;  %1608 = vmatprep.mubr.msk.bf16.mxu0 (!%p1569_p6), %vm1975_vm6, %v1974_v4 }
 0x3f1   : > { %1594 = vmatprep.subr.bf16.mxu0 (!%p1569_p6), %v1974_v4 }
 0x3f4   : > { %1595 = vmatpush3.bf16.msra.mxu0 (!%p1569_p6), %v1813_v13 }
 0x3f5   : > { %1596 = vmatprep.subr.bf16.mxu0 (!%p1569_p6), %v1974_v4 }
 0x3f8   : > { %1597 = vmatpush3.bf16.msra.mxu0 (!%p1569_p6), %v1814_v3 }
 0x3f9   : > { %1598 = vmatprep.subr.bf16.mxu0 (!%p1569_p6), %v1974_v4 }
 0x4c2   : > { %v1171_v63 = vpop.f32.mrb[20].mxu0  ;;  %v1212_v0 = vpop.f32.mrb[20].mxu1 }
 0x4c3   : > { %v1219_v14 = vadd.f32 %v1171_v63, %v2544_v12  ;;  %v1221_v51 = vadd.f32 %v1212_v0, %v2545_v18  ;;  %v1173_v55 = vpop.f32.mrb[21].mxu0  ;;  %v1214_v1 = vpop.f32.mrb[21].mxu1 }
 0x4c4   : > { %v1220_v7 = vadd.f32 %v1173_v55, %v2322_v2  ;;  %v1222_v16 = vadd.f32 %v1214_v1, %v2546_v8  ;;  %v1175_v6 = vpop.f32.mrb[22].mxu0  ;;  %v1216_v9 = vpop.f32.mrb[22].mxu1 }
 0x4c5   : > { %v1562_v11 = vmul.f32 -1.442695, %v1219_v14  ;;  %v1564_v19 = vmul.f32 -1.442695, %v1221_v51  ;;  %v1176_v20 = vpop.f32.mrb[23].mxu0  ;;  %v1217_v21 = vpop.f32.mrb[23].mxu1 }
 0x4c6   : > { %v1563_v22 = vmul.f32 -1.442695, %v1220_v7  ;;  %v1565_v38 = vmul.f32 -1.442695, %v1222_v16 }
 0x4c7   : > { %1792 = vpow2.f32 %v1562_v11 }
 0x4c8   : > { %1794 = vpow2.f32 %v1564_v19 }
 0x4c9   : > { %1796 = vpow2.f32 %v1563_v22 }
 0x4d1   : > { %v1793_v23 = vpop.eup %1792 }
 0x4d2   : > { %v1795_v24 = vpop.eup %1794  ;;  %v1235_v29 = vadd.f32 1.0, %v1793_v23 }
 0x4d3   : > { %v1797_v25 = vpop.eup %1796  ;;  %v1237_v26 = vadd.f32 1.0, %v1795_v24 }
 0x4d4   : > { %v1236_v27 = vadd.f32 1.0, %v1797_v25 }
 0x4d5   : > { %1798 = vrcp.f32 %v1237_v26 }
 0x4d6   : > { %1800 = vrcp.f32 %v1236_v27 }
 0x4d7   : > { %1802 = vrcp.f32 %v1235_v29 }
 0x4d8   : > { %1804 = vpow2.f32 %v1565_v38 }
 0x4df   : > { %v1799_v2 = vpop.eup %1798 }
 0x4e0   : > { %v1801_v30 = vpop.eup %1800  ;;  %v1247_v31 = vmul.f32 2.0, %v1799_v2 }
 0x4e1   : > { %v1249_v32 = vmul.f32 %v1801_v30, %v1128_v15  ;;  %v1803_v35 = vpop.eup %1802 }
 0x4e2   : > { %v1566_v33 = vadd.f32 -1.0, %v1247_v31  ;;  %v1805_v42 = vpop.eup %1804 }
 0x4e3   : > { %v1238_v45 = vadd.f32 1.0, %v1805_v42 }
 0x4e4   : > { %v1250_v36 = vmul.f32 %v1803_v35, %v1566_v33 }
 0x4e6   : > { %v1251_v37 = vadd.f32 %v1250_v36, %v1249_v32 }
 0x4e8   : > { %v1567_v39 = vmul.f32 -2.0, %v1251_v37  ;;  %v1268_v40 = vsel %vm1266_vm5, %v1251_v37, %v1128_v15  ;;  %v1815_v15 = vld [vmem:[%s2513_s4 + $0x18] sm:$0xff] (!%p1569_p6)  }
 0x4e9   : > { %1270 = vst [vmem:[#allocation4] sm:$0xff] %v1268_v40  ;;  %1599 = vmatpush3.bf16.msra.mxu0 (!%p1569_p6), %v1815_v15 }
 0x4ea   : > { %v1254_v41 = vmul.f32 1.442695, %v1567_v39  ;;  %1600 = vmatprep.subr.bf16.mxu0 (!%p1569_p6), %v1974_v4 }
 0x4ec   : > { %1806 = vpow2.f32 %v1254_v41 }
 0x4ed   : > { %1601 = vmatpush3.bf16.msra.mxu0 (!%p1569_p6), %v1816_v28 }
 0x4ee   : > { %1602 = vmatprep.subr.bf16.mxu0 (!%p1569_p6), %v1974_v4 }
 0x4f1   : > { %1603 = vmatpush3.bf16.msra.mxu0 (!%p1569_p6), %v1817_v52 }
 0x4f2   : > { %1604 = vmatprep.subr.bf16.mxu0 (!%p1569_p6), %v1974_v4 }
 0x4f5   : > { %1605 = vmatpush3.bf16.msra.mxu0 (!%p1569_p6), %v1818_v10 }
 0x4f6   : > { %v1807_v43 = vpop.eup %1806  ;;  %1606 = vmatprep.subr.bf16.mxu0 (!%p1569_p6), %v1974_v4 }
 0x4f7   : > { %v1256_v44 = vadd.f32 1.0, %v1807_v43 }
 0x4f9   : > { %1808 = vrcp.f32 %v1256_v44  ;;  %1607 = vmatpush3.bf16.msra.mxu0 (!%p1569_p6), %v1819_v54 }
 0x4fa   : > { %1810 = vrcp.f32 %v1238_v45 }
 0x503   : > { %v1809_v46 = vpop.eup %1808 }
 0x504   : > { %v1259_v47 = vmul.f32 2.0, %v1809_v46  ;;  %v1811_v49 = vpop.eup %1810 }
 0x505   : > { %1274 = sbr.rel (%p1569_p6) target bundleno = 1508 (0x5e4), region = 64 }
 0x506   : > { %v1568_v48 = vadd.f32 -1.0, %v1259_v47 }
 0x508   : > { %v1261_v53 = vmul.f32 %v1811_v49, %v1568_v48 }
 0x50a   : > { %v1267_v61 = vsel %vm1266_vm5, %v1261_v53, %v2432_v50 }
 0x50b   : > { %1269 = vst [vmem:[#allocation3] sm:$0xff] %v1267_v61  ;;  %v1275_v56 = vpack.c.bf16 (!%p1569_p6), %v1267_v61, %v1267_v61 }
 0x50d   : > { %1609 = vmatmul.mubr.bf16.vlgmr.msra.gmra.mrb[0].mxu0 %v1275_v56 }
 0x5e0   : > { %v1381_v58 = vpop.f32.mrb[0].mxu0 }
 0x5e1   : > { %v1382_v59 = vadd.f32 %v1570_v57, %v1381_v58  ;;  %v1610_v60 = vpop.f32.mrb[1].mxu0 }
 0x5e2   : > { %v1384_v5 = vpop.f32.mrb[2].mxu0 }
 0x5e3   : > { %1387 = vst [vmem:[#allocation11] sm:$0xff] %v1382_v59  ;;  %v1611_v50 = vpop.f32.mrb[3].mxu0 }
 0x5e4 PF: > { %p2474_p0 = scmp.eq.s32.totalorder %s1487_s26, 2  ;;  %s1976_s11 = smov [#allocation11]  }
 0x5e5   : > { %s1397_s12 = sshll.u32 %s1976_s11, 4  ;;  %s1398_s12 = int_to_ptr.vmem [resolvable:$true] %s1397_s12 }
 0x5e6   : > { %s1904_s13 = scalar_lea.vmem %s1398_s12, 128  ;;  %p1911_p9 = scmp.lt.s32.totalorder %s1398_s12, %s1398_s12 }
 0x5e7   : > { %p1905_p1 = scmp.ne.s32.totalorder %s1398_s12, %s1904_s13  ;;  %p1912_p2 = scmp.lt.s32.totalorder %s1904_s13, %s1904_s13 }
 0x5e9   : > { %p1906_p4 = pnand %p1905_p1, %p2474_p0  ;;  %p1913_p3 = por %p1912_p2, %p1911_p9 }
 0x5eb   : > { %p1907_p7 = pneg %p1906_p4 }
 0x5ed   : > { %p1914_p5 = pnand %p1913_p3, %p1907_p7 }
 0x5ef   : > { %1917 = shalt.err (!%p1914_p5)
}
 0x5f0   : > { %s1918_s26 = scalar_lea.hbm %s2515_s6, 128 }
 0x5f1   : > { %p1919_p8 = scmp.ne.s32.totalorder %s2515_s6, %s1918_s26  ;;  %p1924_p12 = scmp.lt.u32.totalorder %s1918_s26, %s2515_s6 }
 0x5f3   : > { %p1920_p10 = pnand %p1919_p8, %p2474_p0 }
 0x5f5   : > { %p1921_p11 = pneg %p1920_p10 }
 0x5f7   : > { %p1926_p13 = pnand %p1924_p12, %p1921_p11 }
 0x5f9   : > { %1929 = shalt.err (!%p1926_p13)
}
 0x5fa   : > { %1625 = dma.vmem_to_hbm [thread:$0]  (%p2474_p0), %s1398_s12, 128, %s2515_s6, [#allocation7]  }
 0x5fb   : > { %1951 = dma.done.wait (%p2474_p0), [#allocation7], 128  }
 0x5fc   : > { %1953 = vsyncadd (%p2474_p0), [#allocation7], 4294967168 }
 0x5fd PF: > { %s19_s23 = sadd.s32 1, %s1964_s23   ;;  %s2548_s21 = smov %s1960_s22 }
 0x5fe   : > { %p16_p6 = scmp.ge.s32.totalorder %s19_s23, 5   ;;  %s2549_s22 = smov %s2551_s30 }
 0x600   :  { %18 = sbr.rel (!%p16_p6) target bundleno = 4 (0x4), region = 97 }
 0x607   :  { %1410 = vsyncpa [#allocation6], 1 }
 0x608   :  { %1412 = vsyncpa [#allocation6 + $0x1], 1 }
 0x609   :  { %1413 = vsyncpa [#allocation9], 1 }
 0x60a   :  { %1414 = vsyncpa [#allocation7], 1 }
 0x60b   :  { %1416 = vsyncpa [#allocation7 + $0x1], 1 }

</bundles_post_ra>
